<compile_context>
chip_gen: v7x
topology: tpu7x:2x2x1
jax: 0.10.0
libtpu: 0.0.40
codegen_flags: <defaults>
</compile_context>

<pallas_src>
import math

import jax
import jax.numpy as jnp
import numpy as np
from jax.experimental import pallas as pl
from jax.experimental.pallas import tpu as pltpu

# ----------------------------- problem sizes -------------------------------
B = 2            # batch
T = 8            # tgt sequence length
D = 32           # embed dim (== src channels C)
H_SP, W_SP = 4, 4
S = H_SP * W_SP  # src sequence length after flatten
NUM_HEADS = 4
HEAD_DIM = D // NUM_HEADS
D_FF = 64        # feedforward hidden dim
EPS = 1e-5       # torch.nn.LayerNorm default

BT = B * T       # 16 rows of tgt folded into sublanes
BS = B * S       # 32 rows of src folded into sublanes
NEG_INF = -1e30


# ------------------------------- kernel ------------------------------------
def decoder_layer_kernel(tgt_ref, src_ref,
                         smask_ref, cmask_ref,               # additive batch masks
                         self_wqkv_ref, self_bqkv_ref,       # fused QKV (self)
                         self_wo_ref, self_bo_ref,
                         cross_wq_ref, cross_bq_ref,         # Q (cross)
                         cross_wkv_ref, cross_bkv_ref,       # fused KV (cross)
                         cross_wo_ref, cross_bo_ref,
                         norm_ref,                            # (3, 2, D)
                         ffn_w1_ref, ffn_b1_ref, ffn_w2_ref, ffn_b2_ref,
                         out_ref):
    x = tgt_ref[...]        # (B*T, D)
    src = src_ref[...]      # (B*S, D)
    self_mask = smask_ref[...]    # (B*T, B*T) additive, 0 / -1e30
    cross_mask = cmask_ref[...]   # (B*T, B*S)

    # ---- hoisted parameter loads (each ref read exactly once) ----
    self_wqkv = self_wqkv_ref[...]
    self_bqkv = self_bqkv_ref[...]
    self_wo = self_wo_ref[...]
    self_bo = self_bo_ref[...]
    cross_wq = cross_wq_ref[...]
    cross_bq = cross_bq_ref[...]
    cross_wkv = cross_wkv_ref[...]
    cross_bkv = cross_bkv_ref[...]
    cross_wo = cross_wo_ref[...]
    cross_bo = cross_bo_ref[...]
    g0, be0 = norm_ref[0, 0], norm_ref[0, 1]
    g1, be1 = norm_ref[1, 0], norm_ref[1, 1]
    g2, be2 = norm_ref[2, 0], norm_ref[2, 1]
    w1 = ffn_w1_ref[...]
    b1 = ffn_b1_ref[...]
    w2 = ffn_w2_ref[...]
    b2 = ffn_b2_ref[...]

    scale = 1.0 / math.sqrt(HEAD_DIM)
    # contract last dims of both operands: q @ k^T without materializing k.T
    dn_qkt = (((1,), (1,)), ((), ()))

    def layernorm(v, g, b):
        mu = jnp.mean(v, axis=-1, keepdims=True)
        vc = v - mu
        var = jnp.mean(vc * vc, axis=-1, keepdims=True)
        return vc * jax.lax.rsqrt(var + EPS) * g + b

    def attend(q, k, v, wo, bo, mask):
        # Per-head attention over the whole (batch-folded) sequence.  Heads are
        # unrolled; outputs accumulate through row slices of wo (no concat).
        acc = None
        for h in range(NUM_HEADS):
            sl = slice(h * HEAD_DIM, (h + 1) * HEAD_DIM)
            s = jax.lax.dot_general(q[:, sl], k[:, sl], dn_qkt,
                                    preferred_element_type=jnp.float32)
            s = s * scale + mask
            s = s - jnp.max(s, axis=-1, keepdims=True)
            p = jnp.exp(s)
            p = p * pl.reciprocal(jnp.sum(p, axis=-1, keepdims=True))
            oh = jnp.dot(p, v[:, sl], preferred_element_type=jnp.float32)
            contrib = jnp.dot(oh, wo[sl, :], preferred_element_type=jnp.float32)
            acc = contrib if acc is None else acc + contrib
        return acc + bo

    # 1) self attention (fused QKV projection) + residual + norm
    qkv = jnp.dot(x, self_wqkv, preferred_element_type=jnp.float32) + self_bqkv
    attn1 = attend(qkv[:, :D], qkv[:, D:2 * D], qkv[:, 2 * D:],
                   self_wo, self_bo, self_mask)
    out1 = layernorm(x + attn1, g0, be0)

    # 2) cross attention over src (fused KV projection) + residual + norm
    q2 = jnp.dot(out1, cross_wq, preferred_element_type=jnp.float32) + cross_bq
    kv2 = jnp.dot(src, cross_wkv, preferred_element_type=jnp.float32) + cross_bkv
    attn2 = attend(q2, kv2[:, :D], kv2[:, D:], cross_wo, cross_bo, cross_mask)
    out2 = layernorm(out1 + attn2, g1, be1)

    # 3) feedforward + residual + norm
    hid = jnp.maximum(
        jnp.dot(out2, w1, preferred_element_type=jnp.float32) + b1, 0.0)
    ffn = jnp.dot(hid, w2, preferred_element_type=jnp.float32) + b2
    out3 = layernorm(out2 + ffn, g2, be2)

    out_ref[...] = out3     # single contiguous store site


# ------------------------------- wrapper ------------------------------------
def _batch_block_mask(n_q_per_b, n_k_per_b):
    """Additive mask: 0 where query/key rows belong to the same batch, else -1e30."""
    q_b = np.arange(B * n_q_per_b) // n_q_per_b
    k_b = np.arange(B * n_k_per_b) // n_k_per_b
    return jnp.asarray(
        np.where(q_b[:, None] == k_b[None, :], 0.0, NEG_INF), dtype=jnp.float32)


def transformer_decoder_layer_1d(tgt, src_nchw, params):
    """tgt: (B, T, D) float32.  src_nchw: (B, C, H, W) float32 with C == D."""
    b, c, h, w = src_nchw.shape
    assert b == B and c == D and h * w == S
    # PyTorch forward: src.view(b, c, h*w).transpose(1, 2)  ->  (B, H*W, C)
    src_seq = src_nchw.reshape(b, c, h * w).transpose(0, 2, 1)

    tgt_flat = tgt.reshape(B * T, D)          # fold batch into sublanes
    src_flat = src_seq.reshape(B * S, D)

    self_mask = _batch_block_mask(T, T)       # (B*T, B*T)
    cross_mask = _batch_block_mask(T, S)      # (B*T, B*S)

    full = lambda shape: pl.BlockSpec(shape, lambda i: (0,) * len(shape))

    out_flat = pl.pallas_call(
        decoder_layer_kernel,
        out_shape=jax.ShapeDtypeStruct((B * T, D), jnp.float32),
        grid_spec=pltpu.PrefetchScalarGridSpec(
            num_scalar_prefetch=0,
            grid=(1,),                         # single invocation, whole problem
            in_specs=[
                full((B * T, D)),              # tgt (batch folded)
                full((B * S, D)),              # src (flattened, batch folded)
                full((B * T, B * T)),          # self-attn batch mask
                full((B * T, B * S)),          # cross-attn batch mask
                full((D, 3 * D)), full((1, 3 * D)),   # self fused QKV
                full((D, D)), full((1, D)),           # self Wo / bo
                full((D, D)), full((1, D)),           # cross Wq / bq
                full((D, 2 * D)), full((1, 2 * D)),   # cross fused KV
                full((D, D)), full((1, D)),           # cross Wo / bo
                full((3, 2, D)),                      # layernorm gamma/beta x3
                full((D, D_FF)), full((1, D_FF)),     # ffn w1 / b1
                full((D_FF, D)), full((1, D)),        # ffn w2 / b2
            ],
            out_specs=full((B * T, D)),
        ),
        compiler_params=pltpu.CompilerParams(
            dimension_semantics=("arbitrary",)),
    )(tgt_flat, src_flat, self_mask, cross_mask,
      params["self_wqkv"], params["self_bqkv"],
      params["self_wo"], params["self_bo"],
      params["cross_wq"], params["cross_bq"],
      params["cross_wkv"], params["cross_bkv"],
      params["cross_wo"], params["cross_bo"],
      params["norms"],
      params["ffn_w1"], params["ffn_b1"], params["ffn_w2"], params["ffn_b2"])

    return out_flat.reshape(B, T, D)


# --------------------------- pure-JAX reference ------------------------------
def reference(tgt, src_nchw, params):
    b, c, h, w = src_nchw.shape
    src = src_nchw.reshape(b, c, h * w).transpose(0, 2, 1)

    def ln(x, g, be):
        mu = x.mean(-1, keepdims=True)
        var = ((x - mu) ** 2).mean(-1, keepdims=True)
        return (x - mu) / jnp.sqrt(var + EPS) * g + be

    def mha(q_in, kv_in, wq, bq, wk, bk, wv, bv, wo, bo):
        q = q_in @ wq + bq
        k = kv_in @ wk + bk
        v = kv_in @ wv + bv

        def split(x_):
            return x_.reshape(x_.shape[0], x_.shape[1], NUM_HEADS, HEAD_DIM)

        qh, kh, vh = split(q), split(k), split(v)
        s = jnp.einsum("bqhd,bkhd->bhqk", qh, kh) / math.sqrt(HEAD_DIM)
        p = jax.nn.softmax(s, axis=-1)
        o = jnp.einsum("bhqk,bkhd->bqhd", p, vh).reshape(q.shape)
        return o @ wo + bo

    swqkv, sbqkv = params["self_wqkv"], params["self_bqkv"][0]
    attn1 = mha(tgt, tgt,
                swqkv[:, :D], sbqkv[:D],
                swqkv[:, D:2 * D], sbqkv[D:2 * D],
                swqkv[:, 2 * D:], sbqkv[2 * D:],
                params["self_wo"], params["self_bo"][0])
    out1 = ln(tgt + attn1, params["norms"][0, 0], params["norms"][0, 1])

    cwkv, cbkv = params["cross_wkv"], params["cross_bkv"][0]
    attn2 = mha(out1, src,
                params["cross_wq"], params["cross_bq"][0],
                cwkv[:, :D], cbkv[:D],
                cwkv[:, D:], cbkv[D:],
                params["cross_wo"], params["cross_bo"][0])
    out2 = ln(out1 + attn2, params["norms"][1, 0], params["norms"][1, 1])

    ffn = jnp.maximum(out2 @ params["ffn_w1"] + params["ffn_b1"][0], 0.0) \
          @ params["ffn_w2"] + params["ffn_b2"][0]
    return ln(out2 + ffn, params["norms"][2, 0], params["norms"][2, 1])


# --------------------------------- main --------------------------------------
if __name__ == "__main__":
    key = jax.random.PRNGKey(0)
    ks = jax.random.split(key, 20)

    scale = 0.05
    params = {
        "self_wqkv": scale * jax.random.normal(ks[0], (D, 3 * D), jnp.float32),
        "self_bqkv": scale * jax.random.normal(ks[1], (1, 3 * D), jnp.float32),
        "self_wo":   scale * jax.random.normal(ks[2], (D, D), jnp.float32),
        "self_bo":   scale * jax.random.normal(ks[3], (1, D), jnp.float32),
        "cross_wq":  scale * jax.random.normal(ks[4], (D, D), jnp.float32),
        "cross_bq":  scale * jax.random.normal(ks[5], (1, D), jnp.float32),
        "cross_wkv": scale * jax.random.normal(ks[6], (D, 2 * D), jnp.float32),
        "cross_bkv": scale * jax.random.normal(ks[7], (1, 2 * D), jnp.float32),
        "cross_wo":  scale * jax.random.normal(ks[8], (D, D), jnp.float32),
        "cross_bo":  scale * jax.random.normal(ks[9], (1, D), jnp.float32),
        # gamma init near 1, beta near 0 (perturbed, deterministic)
        "norms": jnp.stack([
            jnp.stack([1.0 + 0.01 * jax.random.normal(ks[10 + i], (D,), jnp.float32),
                       0.01 * jax.random.normal(ks[13 + i], (D,), jnp.float32)])
            for i in range(3)
        ]),
        "ffn_w1": scale * jax.random.normal(ks[16], (D, D_FF), jnp.float32),
        "ffn_b1": scale * jax.random.normal(ks[17], (1, D_FF), jnp.float32),
        "ffn_w2": scale * jax.random.normal(ks[18], (D_FF, D), jnp.float32),
        "ffn_b2": scale * jax.random.normal(ks[19], (1, D), jnp.float32),
    }

    kt, ks_ = jax.random.split(jax.random.PRNGKey(42))
    tgt = jax.random.normal(kt, (B, T, D), jnp.float32)
    src_nchw = jax.random.normal(ks_, (B, D, H_SP, W_SP), jnp.float32)

    out = transformer_decoder_layer_1d(tgt, src_nchw, params)
    out = jax.block_until_ready(out)

    ref = jax.block_until_ready(reference(tgt, src_nchw, params))
    np.testing.assert_allclose(np.asarray(out), np.asarray(ref),
                               rtol=1e-4, atol=1e-5)
    print("KERNEL_OK")
</pallas_src>

<mosaic_0001>
module attributes {stable_mosaic.version = 11 : i64} {
  func.func @decoder_layer_kernel(%arg0: i32, %arg1: memref<16x32xf32, #tpu.memory_space<vmem>>, %arg2: memref<32x32xf32, #tpu.memory_space<vmem>>, %arg3: memref<16x16xf32, #tpu.memory_space<vmem>>, %arg4: memref<16x32xf32, #tpu.memory_space<vmem>>, %arg5: memref<32x96xf32, #tpu.memory_space<vmem>>, %arg6: memref<1x96xf32, #tpu.memory_space<vmem>>, %arg7: memref<32x32xf32, #tpu.memory_space<vmem>>, %arg8: memref<1x32xf32, #tpu.memory_space<vmem>>, %arg9: memref<32x32xf32, #tpu.memory_space<vmem>>, %arg10: memref<1x32xf32, #tpu.memory_space<vmem>>, %arg11: memref<32x64xf32, #tpu.memory_space<vmem>>, %arg12: memref<1x64xf32, #tpu.memory_space<vmem>>, %arg13: memref<32x32xf32, #tpu.memory_space<vmem>>, %arg14: memref<1x32xf32, #tpu.memory_space<vmem>>, %arg15: memref<3x2x32xf32, #tpu.memory_space<vmem>>, %arg16: memref<32x64xf32, #tpu.memory_space<vmem>>, %arg17: memref<1x64xf32, #tpu.memory_space<vmem>>, %arg18: memref<64x32xf32, #tpu.memory_space<vmem>>, %arg19: memref<1x32xf32, #tpu.memory_space<vmem>>, %arg20: memref<16x32xf32, #tpu.memory_space<vmem>>) attributes {dimension_semantics = [#tpu.dimension_semantics<arbitrary>], iteration_bounds = array<i64: 1>, scalar_prefetch = 0 : i64, scratch_operands = 0 : i64, tpu.core_type = #tpu.core_type<tc>, window_params = [{pipeline_mode = #tpu.pipeline_mode<synchronous>, transform_indices = @transform_0, window_bounds = array<i64: 16, 32>}, {pipeline_mode = #tpu.pipeline_mode<synchronous>, transform_indices = @transform_1, window_bounds = array<i64: 32, 32>}, {pipeline_mode = #tpu.pipeline_mode<synchronous>, transform_indices = @transform_2, window_bounds = array<i64: 16, 16>}, {pipeline_mode = #tpu.pipeline_mode<synchronous>, transform_indices = @transform_3, window_bounds = array<i64: 16, 32>}, {pipeline_mode = #tpu.pipeline_mode<synchronous>, transform_indices = @transform_4, window_bounds = array<i64: 32, 96>}, {pipeline_mode = #tpu.pipeline_mode<synchronous>, transform_indices = @transform_5, window_bounds = array<i64: 1, 96>}, {pipeline_mode = #tpu.pipeline_mode<synchronous>, transform_indices = @transform_6, window_bounds = array<i64: 32, 32>}, {pipeline_mode = #tpu.pipeline_mode<synchronous>, transform_indices = @transform_7, window_bounds = array<i64: 1, 32>}, {pipeline_mode = #tpu.pipeline_mode<synchronous>, transform_indices = @transform_8, window_bounds = array<i64: 32, 32>}, {pipeline_mode = #tpu.pipeline_mode<synchronous>, transform_indices = @transform_9, window_bounds = array<i64: 1, 32>}, {pipeline_mode = #tpu.pipeline_mode<synchronous>, transform_indices = @transform_10, window_bounds = array<i64: 32, 64>}, {pipeline_mode = #tpu.pipeline_mode<synchronous>, transform_indices = @transform_11, window_bounds = array<i64: 1, 64>}, {pipeline_mode = #tpu.pipeline_mode<synchronous>, transform_indices = @transform_12, window_bounds = array<i64: 32, 32>}, {pipeline_mode = #tpu.pipeline_mode<synchronous>, transform_indices = @transform_13, window_bounds = array<i64: 1, 32>}, {pipeline_mode = #tpu.pipeline_mode<synchronous>, transform_indices = @transform_14, window_bounds = array<i64: 3, 2, 32>}, {pipeline_mode = #tpu.pipeline_mode<synchronous>, transform_indices = @transform_15, window_bounds = array<i64: 32, 64>}, {pipeline_mode = #tpu.pipeline_mode<synchronous>, transform_indices = @transform_16, window_bounds = array<i64: 1, 64>}, {pipeline_mode = #tpu.pipeline_mode<synchronous>, transform_indices = @transform_17, window_bounds = array<i64: 64, 32>}, {pipeline_mode = #tpu.pipeline_mode<synchronous>, transform_indices = @transform_18, window_bounds = array<i64: 1, 32>}, {pipeline_mode = #tpu.pipeline_mode<synchronous>, transform_indices = @transform_19, window_bounds = array<i64: 16, 32>}]} {
    %c0 = arith.constant 0 : index
    %c0_0 = arith.constant 0 : index
    %0 = vector.load %arg1[%c0, %c0_0] : memref<16x32xf32, #tpu.memory_space<vmem>>, vector<16x32xf32>
    %c0_1 = arith.constant 0 : index
    %c0_2 = arith.constant 0 : index
    %1 = vector.load %arg2[%c0_1, %c0_2] : memref<32x32xf32, #tpu.memory_space<vmem>>, vector<32x32xf32>
    %c0_3 = arith.constant 0 : index
    %c0_4 = arith.constant 0 : index
    %2 = vector.load %arg3[%c0_3, %c0_4] : memref<16x16xf32, #tpu.memory_space<vmem>>, vector<16x16xf32>
    %c0_5 = arith.constant 0 : index
    %c0_6 = arith.constant 0 : index
    %3 = vector.load %arg4[%c0_5, %c0_6] : memref<16x32xf32, #tpu.memory_space<vmem>>, vector<16x32xf32>
    %c0_7 = arith.constant 0 : index
    %c0_8 = arith.constant 0 : index
    %4 = vector.load %arg5[%c0_7, %c0_8] : memref<32x96xf32, #tpu.memory_space<vmem>>, vector<32x96xf32>
    %c0_9 = arith.constant 0 : index
    %c0_10 = arith.constant 0 : index
    %5 = vector.load %arg6[%c0_9, %c0_10] : memref<1x96xf32, #tpu.memory_space<vmem>>, vector<1x96xf32>
    %c0_11 = arith.constant 0 : index
    %c0_12 = arith.constant 0 : index
    %6 = vector.load %arg7[%c0_11, %c0_12] : memref<32x32xf32, #tpu.memory_space<vmem>>, vector<32x32xf32>
    %c0_13 = arith.constant 0 : index
    %c0_14 = arith.constant 0 : index
    %7 = vector.load %arg8[%c0_13, %c0_14] : memref<1x32xf32, #tpu.memory_space<vmem>>, vector<1x32xf32>
    %c0_15 = arith.constant 0 : index
    %c0_16 = arith.constant 0 : index
    %8 = vector.load %arg9[%c0_15, %c0_16] : memref<32x32xf32, #tpu.memory_space<vmem>>, vector<32x32xf32>
    %c0_17 = arith.constant 0 : index
    %c0_18 = arith.constant 0 : index
    %9 = vector.load %arg10[%c0_17, %c0_18] : memref<1x32xf32, #tpu.memory_space<vmem>>, vector<1x32xf32>
    %c0_19 = arith.constant 0 : index
    %c0_20 = arith.constant 0 : index
    %10 = vector.load %arg11[%c0_19, %c0_20] : memref<32x64xf32, #tpu.memory_space<vmem>>, vector<32x64xf32>
    %c0_21 = arith.constant 0 : index
    %c0_22 = arith.constant 0 : index
    %11 = vector.load %arg12[%c0_21, %c0_22] : memref<1x64xf32, #tpu.memory_space<vmem>>, vector<1x64xf32>
    %c0_23 = arith.constant 0 : index
    %c0_24 = arith.constant 0 : index
    %12 = vector.load %arg13[%c0_23, %c0_24] : memref<32x32xf32, #tpu.memory_space<vmem>>, vector<32x32xf32>
    %c0_25 = arith.constant 0 : index
    %c0_26 = arith.constant 0 : index
    %13 = vector.load %arg14[%c0_25, %c0_26] : memref<1x32xf32, #tpu.memory_space<vmem>>, vector<1x32xf32>
    %c0_27 = arith.constant 0 : index
    %c0_28 = arith.constant 0 : index
    %c0_29 = arith.constant 0 : index
    %14 = vector.load %arg15[%c0_27, %c0_28, %c0_29] : memref<3x2x32xf32, #tpu.memory_space<vmem>>, vector<1x1x32xf32>
    %15 = vector.shape_cast %14 : vector<1x1x32xf32> to vector<32xf32>
    %c0_30 = arith.constant 0 : index
    %c1 = arith.constant 1 : index
    %c0_31 = arith.constant 0 : index
    %16 = vector.load %arg15[%c0_30, %c1, %c0_31] : memref<3x2x32xf32, #tpu.memory_space<vmem>>, vector<1x1x32xf32>
    %17 = vector.shape_cast %16 : vector<1x1x32xf32> to vector<32xf32>
    %c1_32 = arith.constant 1 : index
    %c0_33 = arith.constant 0 : index
    %c0_34 = arith.constant 0 : index
    %18 = vector.load %arg15[%c1_32, %c0_33, %c0_34] : memref<3x2x32xf32, #tpu.memory_space<vmem>>, vector<1x1x32xf32>
    %19 = vector.shape_cast %18 : vector<1x1x32xf32> to vector<32xf32>
    %c1_35 = arith.constant 1 : index
    %c1_36 = arith.constant 1 : index
    %c0_37 = arith.constant 0 : index
    %20 = vector.load %arg15[%c1_35, %c1_36, %c0_37] : memref<3x2x32xf32, #tpu.memory_space<vmem>>, vector<1x1x32xf32>
    %21 = vector.shape_cast %20 : vector<1x1x32xf32> to vector<32xf32>
    %c2 = arith.constant 2 : index
    %c0_38 = arith.constant 0 : index
    %c0_39 = arith.constant 0 : index
    %22 = vector.load %arg15[%c2, %c0_38, %c0_39] : memref<3x2x32xf32, #tpu.memory_space<vmem>>, vector<1x1x32xf32>
    %23 = vector.shape_cast %22 : vector<1x1x32xf32> to vector<32xf32>
    %c2_40 = arith.constant 2 : index
    %c1_41 = arith.constant 1 : index
    %c0_42 = arith.constant 0 : index
    %24 = vector.load %arg15[%c2_40, %c1_41, %c0_42] : memref<3x2x32xf32, #tpu.memory_space<vmem>>, vector<1x1x32xf32>
    %25 = vector.shape_cast %24 : vector<1x1x32xf32> to vector<32xf32>
    %c0_43 = arith.constant 0 : index
    %c0_44 = arith.constant 0 : index
    %26 = vector.load %arg16[%c0_43, %c0_44] : memref<32x64xf32, #tpu.memory_space<vmem>>, vector<32x64xf32>
    %c0_45 = arith.constant 0 : index
    %c0_46 = arith.constant 0 : index
    %27 = vector.load %arg17[%c0_45, %c0_46] : memref<1x64xf32, #tpu.memory_space<vmem>>, vector<1x64xf32>
    %c0_47 = arith.constant 0 : index
    %c0_48 = arith.constant 0 : index
    %28 = vector.load %arg18[%c0_47, %c0_48] : memref<64x32xf32, #tpu.memory_space<vmem>>, vector<64x32xf32>
    %c0_49 = arith.constant 0 : index
    %c0_50 = arith.constant 0 : index
    %29 = vector.load %arg19[%c0_49, %c0_50] : memref<1x32xf32, #tpu.memory_space<vmem>>, vector<1x32xf32>
    %cst = arith.constant dense<0.000000e+00> : vector<16x96xf32>
    %30 = tpu.matmul %0, %4, %cst {dimension_numbers = #tpu.dot_dimension_numbers<[1], [0], [0], [1], [0, 0, 1, 1], [], []>} : vector<16x32xf32>, vector<32x96xf32>, vector<16x96xf32> -> vector<16x96xf32>
    %31 = vector.broadcast %5 : vector<1x96xf32> to vector<16x96xf32>
    %32 = arith.addf %30, %31 : vector<16x96xf32>
    %33 = vector.extract_strided_slice %32 {offsets = [0, 0], sizes = [16, 32], strides = [1, 1]} : vector<16x96xf32> to vector<16x32xf32>
    %34 = vector.extract_strided_slice %32 {offsets = [0, 32], sizes = [16, 32], strides = [1, 1]} : vector<16x96xf32> to vector<16x32xf32>
    %35 = vector.extract_strided_slice %32 {offsets = [0, 64], sizes = [16, 32], strides = [1, 1]} : vector<16x96xf32> to vector<16x32xf32>
    %36 = vector.extract_strided_slice %33 {offsets = [0, 0], sizes = [16, 8], strides = [1, 1]} : vector<16x32xf32> to vector<16x8xf32>
    %37 = vector.extract_strided_slice %34 {offsets = [0, 0], sizes = [16, 8], strides = [1, 1]} : vector<16x32xf32> to vector<16x8xf32>
    %cst_51 = arith.constant dense<0.000000e+00> : vector<16x16xf32>
    %38 = tpu.matmul %36, %37, %cst_51 {dimension_numbers = #tpu.dot_dimension_numbers<[1], [1], [0], [0], [0, 0, 1, 0], [], []>} : vector<16x8xf32>, vector<16x8xf32>, vector<16x16xf32> -> vector<16x16xf32>
    %cst_52 = arith.constant 0.353553385 : f32
    %39 = vector.broadcast %cst_52 : f32 to vector<16x16xf32>
    %40 = arith.mulf %38, %39 : vector<16x16xf32>
    %41 = arith.addf %40, %2 : vector<16x16xf32>
    %cst_53 = arith.constant dense<0xFF800000> : vector<16xf32>
    %42 = vector.multi_reduction <maximumf>, %41, %cst_53 [1] : vector<16x16xf32> to vector<16xf32>
    %43 = vector.shape_cast %42 : vector<16xf32> to vector<16x1xf32>
    %44 = vector.broadcast %43 : vector<16x1xf32> to vector<16x16xf32>
    %45 = arith.subf %41, %44 : vector<16x16xf32>
    %46 = math.exp %45 : vector<16x16xf32>
    %cst_54 = arith.constant dense<0.000000e+00> : vector<16xf32>
    %47 = vector.multi_reduction <add>, %46, %cst_54 [1] : vector<16x16xf32> to vector<16xf32>
    %48 = vector.shape_cast %47 : vector<16xf32> to vector<16x1xf32>
    %49 = tpu.reciprocal %48 : vector<16x1xf32> -> vector<16x1xf32>
    %50 = vector.broadcast %49 : vector<16x1xf32> to vector<16x16xf32>
    %51 = arith.mulf %46, %50 : vector<16x16xf32>
    %52 = vector.extract_strided_slice %35 {offsets = [0, 0], sizes = [16, 8], strides = [1, 1]} : vector<16x32xf32> to vector<16x8xf32>
    %cst_55 = arith.constant dense<0.000000e+00> : vector<16x8xf32>
    %53 = tpu.matmul %51, %52, %cst_55 {dimension_numbers = #tpu.dot_dimension_numbers<[1], [0], [0], [1], [0, 0, 1, 1], [], []>} : vector<16x16xf32>, vector<16x8xf32>, vector<16x8xf32> -> vector<16x8xf32>
    %54 = vector.extract_strided_slice %6 {offsets = [0, 0], sizes = [8, 32], strides = [1, 1]} : vector<32x32xf32> to vector<8x32xf32>
    %cst_56 = arith.constant dense<0.000000e+00> : vector<16x32xf32>
    %55 = tpu.matmul %53, %54, %cst_56 {dimension_numbers = #tpu.dot_dimension_numbers<[1], [0], [0], [1], [0, 0, 1, 1], [], []>} : vector<16x8xf32>, vector<8x32xf32>, vector<16x32xf32> -> vector<16x32xf32>
    %56 = vector.extract_strided_slice %33 {offsets = [0, 8], sizes = [16, 8], strides = [1, 1]} : vector<16x32xf32> to vector<16x8xf32>
    %57 = vector.extract_strided_slice %34 {offsets = [0, 8], sizes = [16, 8], strides = [1, 1]} : vector<16x32xf32> to vector<16x8xf32>
    %cst_57 = arith.constant dense<0.000000e+00> : vector<16x16xf32>
    %58 = tpu.matmul %56, %57, %cst_57 {dimension_numbers = #tpu.dot_dimension_numbers<[1], [1], [0], [0], [0, 0, 1, 0], [], []>} : vector<16x8xf32>, vector<16x8xf32>, vector<16x16xf32> -> vector<16x16xf32>
    %cst_58 = arith.constant 0.353553385 : f32
    %59 = vector.broadcast %cst_58 : f32 to vector<16x16xf32>
    %60 = arith.mulf %58, %59 : vector<16x16xf32>
    %61 = arith.addf %60, %2 : vector<16x16xf32>
    %cst_59 = arith.constant dense<0xFF800000> : vector<16xf32>
    %62 = vector.multi_reduction <maximumf>, %61, %cst_59 [1] : vector<16x16xf32> to vector<16xf32>
    %63 = vector.shape_cast %62 : vector<16xf32> to vector<16x1xf32>
    %64 = vector.broadcast %63 : vector<16x1xf32> to vector<16x16xf32>
    %65 = arith.subf %61, %64 : vector<16x16xf32>
    %66 = math.exp %65 : vector<16x16xf32>
    %cst_60 = arith.constant dense<0.000000e+00> : vector<16xf32>
    %67 = vector.multi_reduction <add>, %66, %cst_60 [1] : vector<16x16xf32> to vector<16xf32>
    %68 = vector.shape_cast %67 : vector<16xf32> to vector<16x1xf32>
    %69 = tpu.reciprocal %68 : vector<16x1xf32> -> vector<16x1xf32>
    %70 = vector.broadcast %69 : vector<16x1xf32> to vector<16x16xf32>
    %71 = arith.mulf %66, %70 : vector<16x16xf32>
    %72 = vector.extract_strided_slice %35 {offsets = [0, 8], sizes = [16, 8], strides = [1, 1]} : vector<16x32xf32> to vector<16x8xf32>
    %cst_61 = arith.constant dense<0.000000e+00> : vector<16x8xf32>
    %73 = tpu.matmul %71, %72, %cst_61 {dimension_numbers = #tpu.dot_dimension_numbers<[1], [0], [0], [1], [0, 0, 1, 1], [], []>} : vector<16x16xf32>, vector<16x8xf32>, vector<16x8xf32> -> vector<16x8xf32>
    %74 = vector.extract_strided_slice %6 {offsets = [8, 0], sizes = [8, 32], strides = [1, 1]} : vector<32x32xf32> to vector<8x32xf32>
    %cst_62 = arith.constant dense<0.000000e+00> : vector<16x32xf32>
    %75 = tpu.matmul %73, %74, %cst_62 {dimension_numbers = #tpu.dot_dimension_numbers<[1], [0], [0], [1], [0, 0, 1, 1], [], []>} : vector<16x8xf32>, vector<8x32xf32>, vector<16x32xf32> -> vector<16x32xf32>
    %76 = arith.addf %55, %75 : vector<16x32xf32>
    %77 = vector.extract_strided_slice %33 {offsets = [0, 16], sizes = [16, 8], strides = [1, 1]} : vector<16x32xf32> to vector<16x8xf32>
    %78 = vector.extract_strided_slice %34 {offsets = [0, 16], sizes = [16, 8], strides = [1, 1]} : vector<16x32xf32> to vector<16x8xf32>
    %cst_63 = arith.constant dense<0.000000e+00> : vector<16x16xf32>
    %79 = tpu.matmul %77, %78, %cst_63 {dimension_numbers = #tpu.dot_dimension_numbers<[1], [1], [0], [0], [0, 0, 1, 0], [], []>} : vector<16x8xf32>, vector<16x8xf32>, vector<16x16xf32> -> vector<16x16xf32>
    %cst_64 = arith.constant 0.353553385 : f32
    %80 = vector.broadcast %cst_64 : f32 to vector<16x16xf32>
    %81 = arith.mulf %79, %80 : vector<16x16xf32>
    %82 = arith.addf %81, %2 : vector<16x16xf32>
    %cst_65 = arith.constant dense<0xFF800000> : vector<16xf32>
    %83 = vector.multi_reduction <maximumf>, %82, %cst_65 [1] : vector<16x16xf32> to vector<16xf32>
    %84 = vector.shape_cast %83 : vector<16xf32> to vector<16x1xf32>
    %85 = vector.broadcast %84 : vector<16x1xf32> to vector<16x16xf32>
    %86 = arith.subf %82, %85 : vector<16x16xf32>
    %87 = math.exp %86 : vector<16x16xf32>
    %cst_66 = arith.constant dense<0.000000e+00> : vector<16xf32>
    %88 = vector.multi_reduction <add>, %87, %cst_66 [1] : vector<16x16xf32> to vector<16xf32>
    %89 = vector.shape_cast %88 : vector<16xf32> to vector<16x1xf32>
    %90 = tpu.reciprocal %89 : vector<16x1xf32> -> vector<16x1xf32>
    %91 = vector.broadcast %90 : vector<16x1xf32> to vector<16x16xf32>
    %92 = arith.mulf %87, %91 : vector<16x16xf32>
    %93 = vector.extract_strided_slice %35 {offsets = [0, 16], sizes = [16, 8], strides = [1, 1]} : vector<16x32xf32> to vector<16x8xf32>
    %cst_67 = arith.constant dense<0.000000e+00> : vector<16x8xf32>
    %94 = tpu.matmul %92, %93, %cst_67 {dimension_numbers = #tpu.dot_dimension_numbers<[1], [0], [0], [1], [0, 0, 1, 1], [], []>} : vector<16x16xf32>, vector<16x8xf32>, vector<16x8xf32> -> vector<16x8xf32>
    %95 = vector.extract_strided_slice %6 {offsets = [16, 0], sizes = [8, 32], strides = [1, 1]} : vector<32x32xf32> to vector<8x32xf32>
    %cst_68 = arith.constant dense<0.000000e+00> : vector<16x32xf32>
    %96 = tpu.matmul %94, %95, %cst_68 {dimension_numbers = #tpu.dot_dimension_numbers<[1], [0], [0], [1], [0, 0, 1, 1], [], []>} : vector<16x8xf32>, vector<8x32xf32>, vector<16x32xf32> -> vector<16x32xf32>
    %97 = arith.addf %76, %96 : vector<16x32xf32>
    %98 = vector.extract_strided_slice %33 {offsets = [0, 24], sizes = [16, 8], strides = [1, 1]} : vector<16x32xf32> to vector<16x8xf32>
    %99 = vector.extract_strided_slice %34 {offsets = [0, 24], sizes = [16, 8], strides = [1, 1]} : vector<16x32xf32> to vector<16x8xf32>
    %cst_69 = arith.constant dense<0.000000e+00> : vector<16x16xf32>
    %100 = tpu.matmul %98, %99, %cst_69 {dimension_numbers = #tpu.dot_dimension_numbers<[1], [1], [0], [0], [0, 0, 1, 0], [], []>} : vector<16x8xf32>, vector<16x8xf32>, vector<16x16xf32> -> vector<16x16xf32>
    %cst_70 = arith.constant 0.353553385 : f32
    %101 = vector.broadcast %cst_70 : f32 to vector<16x16xf32>
    %102 = arith.mulf %100, %101 : vector<16x16xf32>
    %103 = arith.addf %102, %2 : vector<16x16xf32>
    %cst_71 = arith.constant dense<0xFF800000> : vector<16xf32>
    %104 = vector.multi_reduction <maximumf>, %103, %cst_71 [1] : vector<16x16xf32> to vector<16xf32>
    %105 = vector.shape_cast %104 : vector<16xf32> to vector<16x1xf32>
    %106 = vector.broadcast %105 : vector<16x1xf32> to vector<16x16xf32>
    %107 = arith.subf %103, %106 : vector<16x16xf32>
    %108 = math.exp %107 : vector<16x16xf32>
    %cst_72 = arith.constant dense<0.000000e+00> : vector<16xf32>
    %109 = vector.multi_reduction <add>, %108, %cst_72 [1] : vector<16x16xf32> to vector<16xf32>
    %110 = vector.shape_cast %109 : vector<16xf32> to vector<16x1xf32>
    %111 = tpu.reciprocal %110 : vector<16x1xf32> -> vector<16x1xf32>
    %112 = vector.broadcast %111 : vector<16x1xf32> to vector<16x16xf32>
    %113 = arith.mulf %108, %112 : vector<16x16xf32>
    %114 = vector.extract_strided_slice %35 {offsets = [0, 24], sizes = [16, 8], strides = [1, 1]} : vector<16x32xf32> to vector<16x8xf32>
    %cst_73 = arith.constant dense<0.000000e+00> : vector<16x8xf32>
    %115 = tpu.matmul %113, %114, %cst_73 {dimension_numbers = #tpu.dot_dimension_numbers<[1], [0], [0], [1], [0, 0, 1, 1], [], []>} : vector<16x16xf32>, vector<16x8xf32>, vector<16x8xf32> -> vector<16x8xf32>
    %116 = vector.extract_strided_slice %6 {offsets = [24, 0], sizes = [8, 32], strides = [1, 1]} : vector<32x32xf32> to vector<8x32xf32>
    %cst_74 = arith.constant dense<0.000000e+00> : vector<16x32xf32>
    %117 = tpu.matmul %115, %116, %cst_74 {dimension_numbers = #tpu.dot_dimension_numbers<[1], [0], [0], [1], [0, 0, 1, 1], [], []>} : vector<16x8xf32>, vector<8x32xf32>, vector<16x32xf32> -> vector<16x32xf32>
    %118 = arith.addf %97, %117 : vector<16x32xf32>
    %119 = vector.broadcast %7 : vector<1x32xf32> to vector<16x32xf32>
    %120 = arith.addf %118, %119 : vector<16x32xf32>
    %121 = arith.addf %0, %120 : vector<16x32xf32>
    %cst_75 = arith.constant dense<0.000000e+00> : vector<16xf32>
    %122 = vector.multi_reduction <add>, %121, %cst_75 [1] : vector<16x32xf32> to vector<16xf32>
    %123 = vector.shape_cast %122 : vector<16xf32> to vector<16x1xf32>
    %cst_76 = arith.constant 3.200000e+01 : f32
    %124 = vector.broadcast %cst_76 : f32 to vector<16x1xf32>
    %125 = arith.divf %123, %124 : vector<16x1xf32>
    %126 = vector.broadcast %125 : vector<16x1xf32> to vector<16x32xf32>
    %127 = arith.subf %121, %126 : vector<16x32xf32>
    %128 = arith.mulf %127, %127 : vector<16x32xf32>
    %cst_77 = arith.constant dense<0.000000e+00> : vector<16xf32>
    %129 = vector.multi_reduction <add>, %128, %cst_77 [1] : vector<16x32xf32> to vector<16xf32>
    %130 = vector.shape_cast %129 : vector<16xf32> to vector<16x1xf32>
    %cst_78 = arith.constant 3.200000e+01 : f32
    %131 = vector.broadcast %cst_78 : f32 to vector<16x1xf32>
    %132 = arith.divf %130, %131 : vector<16x1xf32>
    %cst_79 = arith.constant 9.99999974E-6 : f32
    %133 = vector.broadcast %cst_79 : f32 to vector<16x1xf32>
    %134 = arith.addf %132, %133 : vector<16x1xf32>
    %135 = math.rsqrt %134 : vector<16x1xf32>
    %136 = vector.broadcast %135 : vector<16x1xf32> to vector<16x32xf32>
    %137 = arith.mulf %127, %136 : vector<16x32xf32>
    %138 = vector.shape_cast %15 : vector<32xf32> to vector<1x32xf32>
    %139 = vector.broadcast %138 : vector<1x32xf32> to vector<16x32xf32>
    %140 = arith.mulf %137, %139 : vector<16x32xf32>
    %141 = vector.shape_cast %17 : vector<32xf32> to vector<1x32xf32>
    %142 = vector.broadcast %141 : vector<1x32xf32> to vector<16x32xf32>
    %143 = arith.addf %140, %142 : vector<16x32xf32>
    %cst_80 = arith.constant dense<0.000000e+00> : vector<16x32xf32>
    %144 = tpu.matmul %143, %8, %cst_80 {dimension_numbers = #tpu.dot_dimension_numbers<[1], [0], [0], [1], [0, 0, 1, 1], [], []>} : vector<16x32xf32>, vector<32x32xf32>, vector<16x32xf32> -> vector<16x32xf32>
    %145 = vector.broadcast %9 : vector<1x32xf32> to vector<16x32xf32>
    %146 = arith.addf %144, %145 : vector<16x32xf32>
    %cst_81 = arith.constant dense<0.000000e+00> : vector<32x64xf32>
    %147 = tpu.matmul %1, %10, %cst_81 {dimension_numbers = #tpu.dot_dimension_numbers<[1], [0], [0], [1], [0, 0, 1, 1], [], []>} : vector<32x32xf32>, vector<32x64xf32>, vector<32x64xf32> -> vector<32x64xf32>
    %148 = vector.broadcast %11 : vector<1x64xf32> to vector<32x64xf32>
    %149 = arith.addf %147, %148 : vector<32x64xf32>
    %150 = vector.extract_strided_slice %149 {offsets = [0, 0], sizes = [32, 32], strides = [1, 1]} : vector<32x64xf32> to vector<32x32xf32>
    %151 = vector.extract_strided_slice %149 {offsets = [0, 32], sizes = [32, 32], strides = [1, 1]} : vector<32x64xf32> to vector<32x32xf32>
    %152 = vector.extract_strided_slice %146 {offsets = [0, 0], sizes = [16, 8], strides = [1, 1]} : vector<16x32xf32> to vector<16x8xf32>
    %153 = vector.extract_strided_slice %150 {offsets = [0, 0], sizes = [32, 8], strides = [1, 1]} : vector<32x32xf32> to vector<32x8xf32>
    %cst_82 = arith.constant dense<0.000000e+00> : vector<16x32xf32>
    %154 = tpu.matmul %152, %153, %cst_82 {dimension_numbers = #tpu.dot_dimension_numbers<[1], [1], [0], [0], [0, 0, 1, 0], [], []>} : vector<16x8xf32>, vector<32x8xf32>, vector<16x32xf32> -> vector<16x32xf32>
    %cst_83 = arith.constant 0.353553385 : f32
    %155 = vector.broadcast %cst_83 : f32 to vector<16x32xf32>
    %156 = arith.mulf %154, %155 : vector<16x32xf32>
    %157 = arith.addf %156, %3 : vector<16x32xf32>
    %cst_84 = arith.constant dense<0xFF800000> : vector<16xf32>
    %158 = vector.multi_reduction <maximumf>, %157, %cst_84 [1] : vector<16x32xf32> to vector<16xf32>
    %159 = vector.shape_cast %158 : vector<16xf32> to vector<16x1xf32>
    %160 = vector.broadcast %159 : vector<16x1xf32> to vector<16x32xf32>
    %161 = arith.subf %157, %160 : vector<16x32xf32>
    %162 = math.exp %161 : vector<16x32xf32>
    %cst_85 = arith.constant dense<0.000000e+00> : vector<16xf32>
    %163 = vector.multi_reduction <add>, %162, %cst_85 [1] : vector<16x32xf32> to vector<16xf32>
    %164 = vector.shape_cast %163 : vector<16xf32> to vector<16x1xf32>
    %165 = tpu.reciprocal %164 : vector<16x1xf32> -> vector<16x1xf32>
    %166 = vector.broadcast %165 : vector<16x1xf32> to vector<16x32xf32>
    %167 = arith.mulf %162, %166 : vector<16x32xf32>
    %168 = vector.extract_strided_slice %151 {offsets = [0, 0], sizes = [32, 8], strides = [1, 1]} : vector<32x32xf32> to vector<32x8xf32>
    %cst_86 = arith.constant dense<0.000000e+00> : vector<16x8xf32>
    %169 = tpu.matmul %167, %168, %cst_86 {dimension_numbers = #tpu.dot_dimension_numbers<[1], [0], [0], [1], [0, 0, 1, 1], [], []>} : vector<16x32xf32>, vector<32x8xf32>, vector<16x8xf32> -> vector<16x8xf32>
    %170 = vector.extract_strided_slice %12 {offsets = [0, 0], sizes = [8, 32], strides = [1, 1]} : vector<32x32xf32> to vector<8x32xf32>
    %cst_87 = arith.constant dense<0.000000e+00> : vector<16x32xf32>
    %171 = tpu.matmul %169, %170, %cst_87 {dimension_numbers = #tpu.dot_dimension_numbers<[1], [0], [0], [1], [0, 0, 1, 1], [], []>} : vector<16x8xf32>, vector<8x32xf32>, vector<16x32xf32> -> vector<16x32xf32>
    %172 = vector.extract_strided_slice %146 {offsets = [0, 8], sizes = [16, 8], strides = [1, 1]} : vector<16x32xf32> to vector<16x8xf32>
    %173 = vector.extract_strided_slice %150 {offsets = [0, 8], sizes = [32, 8], strides = [1, 1]} : vector<32x32xf32> to vector<32x8xf32>
    %cst_88 = arith.constant dense<0.000000e+00> : vector<16x32xf32>
    %174 = tpu.matmul %172, %173, %cst_88 {dimension_numbers = #tpu.dot_dimension_numbers<[1], [1], [0], [0], [0, 0, 1, 0], [], []>} : vector<16x8xf32>, vector<32x8xf32>, vector<16x32xf32> -> vector<16x32xf32>
    %cst_89 = arith.constant 0.353553385 : f32
    %175 = vector.broadcast %cst_89 : f32 to vector<16x32xf32>
    %176 = arith.mulf %174, %175 : vector<16x32xf32>
    %177 = arith.addf %176, %3 : vector<16x32xf32>
    %cst_90 = arith.constant dense<0xFF800000> : vector<16xf32>
    %178 = vector.multi_reduction <maximumf>, %177, %cst_90 [1] : vector<16x32xf32> to vector<16xf32>
    %179 = vector.shape_cast %178 : vector<16xf32> to vector<16x1xf32>
    %180 = vector.broadcast %179 : vector<16x1xf32> to vector<16x32xf32>
    %181 = arith.subf %177, %180 : vector<16x32xf32>
    %182 = math.exp %181 : vector<16x32xf32>
    %cst_91 = arith.constant dense<0.000000e+00> : vector<16xf32>
    %183 = vector.multi_reduction <add>, %182, %cst_91 [1] : vector<16x32xf32> to vector<16xf32>
    %184 = vector.shape_cast %183 : vector<16xf32> to vector<16x1xf32>
    %185 = tpu.reciprocal %184 : vector<16x1xf32> -> vector<16x1xf32>
    %186 = vector.broadcast %185 : vector<16x1xf32> to vector<16x32xf32>
    %187 = arith.mulf %182, %186 : vector<16x32xf32>
    %188 = vector.extract_strided_slice %151 {offsets = [0, 8], sizes = [32, 8], strides = [1, 1]} : vector<32x32xf32> to vector<32x8xf32>
    %cst_92 = arith.constant dense<0.000000e+00> : vector<16x8xf32>
    %189 = tpu.matmul %187, %188, %cst_92 {dimension_numbers = #tpu.dot_dimension_numbers<[1], [0], [0], [1], [0, 0, 1, 1], [], []>} : vector<16x32xf32>, vector<32x8xf32>, vector<16x8xf32> -> vector<16x8xf32>
    %190 = vector.extract_strided_slice %12 {offsets = [8, 0], sizes = [8, 32], strides = [1, 1]} : vector<32x32xf32> to vector<8x32xf32>
    %cst_93 = arith.constant dense<0.000000e+00> : vector<16x32xf32>
    %191 = tpu.matmul %189, %190, %cst_93 {dimension_numbers = #tpu.dot_dimension_numbers<[1], [0], [0], [1], [0, 0, 1, 1], [], []>} : vector<16x8xf32>, vector<8x32xf32>, vector<16x32xf32> -> vector<16x32xf32>
    %192 = arith.addf %171, %191 : vector<16x32xf32>
    %193 = vector.extract_strided_slice %146 {offsets = [0, 16], sizes = [16, 8], strides = [1, 1]} : vector<16x32xf32> to vector<16x8xf32>
    %194 = vector.extract_strided_slice %150 {offsets = [0, 16], sizes = [32, 8], strides = [1, 1]} : vector<32x32xf32> to vector<32x8xf32>
    %cst_94 = arith.constant dense<0.000000e+00> : vector<16x32xf32>
    %195 = tpu.matmul %193, %194, %cst_94 {dimension_numbers = #tpu.dot_dimension_numbers<[1], [1], [0], [0], [0, 0, 1, 0], [], []>} : vector<16x8xf32>, vector<32x8xf32>, vector<16x32xf32> -> vector<16x32xf32>
    %cst_95 = arith.constant 0.353553385 : f32
    %196 = vector.broadcast %cst_95 : f32 to vector<16x32xf32>
    %197 = arith.mulf %195, %196 : vector<16x32xf32>
    %198 = arith.addf %197, %3 : vector<16x32xf32>
    %cst_96 = arith.constant dense<0xFF800000> : vector<16xf32>
    %199 = vector.multi_reduction <maximumf>, %198, %cst_96 [1] : vector<16x32xf32> to vector<16xf32>
    %200 = vector.shape_cast %199 : vector<16xf32> to vector<16x1xf32>
    %201 = vector.broadcast %200 : vector<16x1xf32> to vector<16x32xf32>
    %202 = arith.subf %198, %201 : vector<16x32xf32>
    %203 = math.exp %202 : vector<16x32xf32>
    %cst_97 = arith.constant dense<0.000000e+00> : vector<16xf32>
    %204 = vector.multi_reduction <add>, %203, %cst_97 [1] : vector<16x32xf32> to vector<16xf32>
    %205 = vector.shape_cast %204 : vector<16xf32> to vector<16x1xf32>
    %206 = tpu.reciprocal %205 : vector<16x1xf32> -> vector<16x1xf32>
    %207 = vector.broadcast %206 : vector<16x1xf32> to vector<16x32xf32>
    %208 = arith.mulf %203, %207 : vector<16x32xf32>
    %209 = vector.extract_strided_slice %151 {offsets = [0, 16], sizes = [32, 8], strides = [1, 1]} : vector<32x32xf32> to vector<32x8xf32>
    %cst_98 = arith.constant dense<0.000000e+00> : vector<16x8xf32>
    %210 = tpu.matmul %208, %209, %cst_98 {dimension_numbers = #tpu.dot_dimension_numbers<[1], [0], [0], [1], [0, 0, 1, 1], [], []>} : vector<16x32xf32>, vector<32x8xf32>, vector<16x8xf32> -> vector<16x8xf32>
    %211 = vector.extract_strided_slice %12 {offsets = [16, 0], sizes = [8, 32], strides = [1, 1]} : vector<32x32xf32> to vector<8x32xf32>
    %cst_99 = arith.constant dense<0.000000e+00> : vector<16x32xf32>
    %212 = tpu.matmul %210, %211, %cst_99 {dimension_numbers = #tpu.dot_dimension_numbers<[1], [0], [0], [1], [0, 0, 1, 1], [], []>} : vector<16x8xf32>, vector<8x32xf32>, vector<16x32xf32> -> vector<16x32xf32>
    %213 = arith.addf %192, %212 : vector<16x32xf32>
    %214 = vector.extract_strided_slice %146 {offsets = [0, 24], sizes = [16, 8], strides = [1, 1]} : vector<16x32xf32> to vector<16x8xf32>
    %215 = vector.extract_strided_slice %150 {offsets = [0, 24], sizes = [32, 8], strides = [1, 1]} : vector<32x32xf32> to vector<32x8xf32>
    %cst_100 = arith.constant dense<0.000000e+00> : vector<16x32xf32>
    %216 = tpu.matmul %214, %215, %cst_100 {dimension_numbers = #tpu.dot_dimension_numbers<[1], [1], [0], [0], [0, 0, 1, 0], [], []>} : vector<16x8xf32>, vector<32x8xf32>, vector<16x32xf32> -> vector<16x32xf32>
    %cst_101 = arith.constant 0.353553385 : f32
    %217 = vector.broadcast %cst_101 : f32 to vector<16x32xf32>
    %218 = arith.mulf %216, %217 : vector<16x32xf32>
    %219 = arith.addf %218, %3 : vector<16x32xf32>
    %cst_102 = arith.constant dense<0xFF800000> : vector<16xf32>
    %220 = vector.multi_reduction <maximumf>, %219, %cst_102 [1] : vector<16x32xf32> to vector<16xf32>
    %221 = vector.shape_cast %220 : vector<16xf32> to vector<16x1xf32>
    %222 = vector.broadcast %221 : vector<16x1xf32> to vector<16x32xf32>
    %223 = arith.subf %219, %222 : vector<16x32xf32>
    %224 = math.exp %223 : vector<16x32xf32>
    %cst_103 = arith.constant dense<0.000000e+00> : vector<16xf32>
    %225 = vector.multi_reduction <add>, %224, %cst_103 [1] : vector<16x32xf32> to vector<16xf32>
    %226 = vector.shape_cast %225 : vector<16xf32> to vector<16x1xf32>
    %227 = tpu.reciprocal %226 : vector<16x1xf32> -> vector<16x1xf32>
    %228 = vector.broadcast %227 : vector<16x1xf32> to vector<16x32xf32>
    %229 = arith.mulf %224, %228 : vector<16x32xf32>
    %230 = vector.extract_strided_slice %151 {offsets = [0, 24], sizes = [32, 8], strides = [1, 1]} : vector<32x32xf32> to vector<32x8xf32>
    %cst_104 = arith.constant dense<0.000000e+00> : vector<16x8xf32>
    %231 = tpu.matmul %229, %230, %cst_104 {dimension_numbers = #tpu.dot_dimension_numbers<[1], [0], [0], [1], [0, 0, 1, 1], [], []>} : vector<16x32xf32>, vector<32x8xf32>, vector<16x8xf32> -> vector<16x8xf32>
    %232 = vector.extract_strided_slice %12 {offsets = [24, 0], sizes = [8, 32], strides = [1, 1]} : vector<32x32xf32> to vector<8x32xf32>
    %cst_105 = arith.constant dense<0.000000e+00> : vector<16x32xf32>
    %233 = tpu.matmul %231, %232, %cst_105 {dimension_numbers = #tpu.dot_dimension_numbers<[1], [0], [0], [1], [0, 0, 1, 1], [], []>} : vector<16x8xf32>, vector<8x32xf32>, vector<16x32xf32> -> vector<16x32xf32>
    %234 = arith.addf %213, %233 : vector<16x32xf32>
    %235 = vector.broadcast %13 : vector<1x32xf32> to vector<16x32xf32>
    %236 = arith.addf %234, %235 : vector<16x32xf32>
    %237 = arith.addf %143, %236 : vector<16x32xf32>
    %cst_106 = arith.constant dense<0.000000e+00> : vector<16xf32>
    %238 = vector.multi_reduction <add>, %237, %cst_106 [1] : vector<16x32xf32> to vector<16xf32>
    %239 = vector.shape_cast %238 : vector<16xf32> to vector<16x1xf32>
    %cst_107 = arith.constant 3.200000e+01 : f32
    %240 = vector.broadcast %cst_107 : f32 to vector<16x1xf32>
    %241 = arith.divf %239, %240 : vector<16x1xf32>
    %242 = vector.broadcast %241 : vector<16x1xf32> to vector<16x32xf32>
    %243 = arith.subf %237, %242 : vector<16x32xf32>
    %244 = arith.mulf %243, %243 : vector<16x32xf32>
    %cst_108 = arith.constant dense<0.000000e+00> : vector<16xf32>
    %245 = vector.multi_reduction <add>, %244, %cst_108 [1] : vector<16x32xf32> to vector<16xf32>
    %246 = vector.shape_cast %245 : vector<16xf32> to vector<16x1xf32>
    %cst_109 = arith.constant 3.200000e+01 : f32
    %247 = vector.broadcast %cst_109 : f32 to vector<16x1xf32>
    %248 = arith.divf %246, %247 : vector<16x1xf32>
    %cst_110 = arith.constant 9.99999974E-6 : f32
    %249 = vector.broadcast %cst_110 : f32 to vector<16x1xf32>
    %250 = arith.addf %248, %249 : vector<16x1xf32>
    %251 = math.rsqrt %250 : vector<16x1xf32>
    %252 = vector.broadcast %251 : vector<16x1xf32> to vector<16x32xf32>
    %253 = arith.mulf %243, %252 : vector<16x32xf32>
    %254 = vector.shape_cast %19 : vector<32xf32> to vector<1x32xf32>
    %255 = vector.broadcast %254 : vector<1x32xf32> to vector<16x32xf32>
    %256 = arith.mulf %253, %255 : vector<16x32xf32>
    %257 = vector.shape_cast %21 : vector<32xf32> to vector<1x32xf32>
    %258 = vector.broadcast %257 : vector<1x32xf32> to vector<16x32xf32>
    %259 = arith.addf %256, %258 : vector<16x32xf32>
    %cst_111 = arith.constant dense<0.000000e+00> : vector<16x64xf32>
    %260 = tpu.matmul %259, %26, %cst_111 {dimension_numbers = #tpu.dot_dimension_numbers<[1], [0], [0], [1], [0, 0, 1, 1], [], []>} : vector<16x32xf32>, vector<32x64xf32>, vector<16x64xf32> -> vector<16x64xf32>
    %261 = vector.broadcast %27 : vector<1x64xf32> to vector<16x64xf32>
    %262 = arith.addf %260, %261 : vector<16x64xf32>
    %cst_112 = arith.constant 0.000000e+00 : f32
    %263 = vector.broadcast %cst_112 : f32 to vector<16x64xf32>
    %264 = arith.maximumf %262, %263 : vector<16x64xf32>
    %cst_113 = arith.constant dense<0.000000e+00> : vector<16x32xf32>
    %265 = tpu.matmul %264, %28, %cst_113 {dimension_numbers = #tpu.dot_dimension_numbers<[1], [0], [0], [1], [0, 0, 1, 1], [], []>} : vector<16x64xf32>, vector<64x32xf32>, vector<16x32xf32> -> vector<16x32xf32>
    %266 = vector.broadcast %29 : vector<1x32xf32> to vector<16x32xf32>
    %267 = arith.addf %265, %266 : vector<16x32xf32>
    %268 = arith.addf %259, %267 : vector<16x32xf32>
    %cst_114 = arith.constant dense<0.000000e+00> : vector<16xf32>
    %269 = vector.multi_reduction <add>, %268, %cst_114 [1] : vector<16x32xf32> to vector<16xf32>
    %270 = vector.shape_cast %269 : vector<16xf32> to vector<16x1xf32>
    %cst_115 = arith.constant 3.200000e+01 : f32
    %271 = vector.broadcast %cst_115 : f32 to vector<16x1xf32>
    %272 = arith.divf %270, %271 : vector<16x1xf32>
    %273 = vector.broadcast %272 : vector<16x1xf32> to vector<16x32xf32>
    %274 = arith.subf %268, %273 : vector<16x32xf32>
    %275 = arith.mulf %274, %274 : vector<16x32xf32>
    %cst_116 = arith.constant dense<0.000000e+00> : vector<16xf32>
    %276 = vector.multi_reduction <add>, %275, %cst_116 [1] : vector<16x32xf32> to vector<16xf32>
    %277 = vector.shape_cast %276 : vector<16xf32> to vector<16x1xf32>
    %cst_117 = arith.constant 3.200000e+01 : f32
    %278 = vector.broadcast %cst_117 : f32 to vector<16x1xf32>
    %279 = arith.divf %277, %278 : vector<16x1xf32>
    %cst_118 = arith.constant 9.99999974E-6 : f32
    %280 = vector.broadcast %cst_118 : f32 to vector<16x1xf32>
    %281 = arith.addf %279, %280 : vector<16x1xf32>
    %282 = math.rsqrt %281 : vector<16x1xf32>
    %283 = vector.broadcast %282 : vector<16x1xf32> to vector<16x32xf32>
    %284 = arith.mulf %274, %283 : vector<16x32xf32>
    %285 = vector.shape_cast %23 : vector<32xf32> to vector<1x32xf32>
    %286 = vector.broadcast %285 : vector<1x32xf32> to vector<16x32xf32>
    %287 = arith.mulf %284, %286 : vector<16x32xf32>
    %288 = vector.shape_cast %25 : vector<32xf32> to vector<1x32xf32>
    %289 = vector.broadcast %288 : vector<1x32xf32> to vector<16x32xf32>
    %290 = arith.addf %287, %289 : vector<16x32xf32>
    %c0_119 = arith.constant 0 : index
    %c0_120 = arith.constant 0 : index
    %291 = vector.load %arg20[%c0_119, %c0_120] : memref<16x32xf32, #tpu.memory_space<vmem>>, vector<16x32xf32>
    tpu.vector_store %arg20[%c0_119, %c0_120], %290 {strides = array<i32>} : memref<16x32xf32, #tpu.memory_space<vmem>>, vector<16x32xf32>,
    return
  }
  func.func @transform_0(%arg0: i32) -> (i32, i32) {
    %c0_i32 = arith.constant 0 : i32
    %c0_i32_0 = arith.constant 0 : i32
    %c0_i32_1 = arith.constant 0 : i32
    return %c0_i32, %c0_i32_0 : i32, i32
  }
  func.func @transform_1(%arg0: i32) -> (i32, i32) {
    %c0_i32 = arith.constant 0 : i32
    %c0_i32_0 = arith.constant 0 : i32
    %c0_i32_1 = arith.constant 0 : i32
    return %c0_i32, %c0_i32_0 : i32, i32
  }
  func.func @transform_2(%arg0: i32) -> (i32, i32) {
    %c0_i32 = arith.constant 0 : i32
    %c0_i32_0 = arith.constant 0 : i32
    %c0_i32_1 = arith.constant 0 : i32
    return %c0_i32, %c0_i32_0 : i32, i32
  }
  func.func @transform_3(%arg0: i32) -> (i32, i32) {
    %c0_i32 = arith.constant 0 : i32
    %c0_i32_0 = arith.constant 0 : i32
    %c0_i32_1 = arith.constant 0 : i32
    return %c0_i32, %c0_i32_0 : i32, i32
  }
  func.func @transform_4(%arg0: i32) -> (i32, i32) {
    %c0_i32 = arith.constant 0 : i32
    %c0_i32_0 = arith.constant 0 : i32
    %c0_i32_1 = arith.constant 0 : i32
    return %c0_i32, %c0_i32_0 : i32, i32
  }
  func.func @transform_5(%arg0: i32) -> (i32, i32) {
    %c0_i32 = arith.constant 0 : i32
    %c0_i32_0 = arith.constant 0 : i32
    %c0_i32_1 = arith.constant 0 : i32
    return %c0_i32, %c0_i32_0 : i32, i32
  }
  func.func @transform_6(%arg0: i32) -> (i32, i32) {
    %c0_i32 = arith.constant 0 : i32
    %c0_i32_0 = arith.constant 0 : i32
    %c0_i32_1 = arith.constant 0 : i32
    return %c0_i32, %c0_i32_0 : i32, i32
  }
  func.func @transform_7(%arg0: i32) -> (i32, i32) {
    %c0_i32 = arith.constant 0 : i32
    %c0_i32_0 = arith.constant 0 : i32
    %c0_i32_1 = arith.constant 0 : i32
    return %c0_i32, %c0_i32_0 : i32, i32
  }
  func.func @transform_8(%arg0: i32) -> (i32, i32) {
    %c0_i32 = arith.constant 0 : i32
    %c0_i32_0 = arith.constant 0 : i32
    %c0_i32_1 = arith.constant 0 : i32
    return %c0_i32, %c0_i32_0 : i32, i32
  }
  func.func @transform_9(%arg0: i32) -> (i32, i32) {
    %c0_i32 = arith.constant 0 : i32
    %c0_i32_0 = arith.constant 0 : i32
    %c0_i32_1 = arith.constant 0 : i32
    return %c0_i32, %c0_i32_0 : i32, i32
  }
  func.func @transform_10(%arg0: i32) -> (i32, i32) {
    %c0_i32 = arith.constant 0 : i32
    %c0_i32_0 = arith.constant 0 : i32
    %c0_i32_1 = arith.constant 0 : i32
    return %c0_i32, %c0_i32_0 : i32, i32
  }
  func.func @transform_11(%arg0: i32) -> (i32, i32) {
    %c0_i32 = arith.constant 0 : i32
    %c0_i32_0 = arith.constant 0 : i32
    %c0_i32_1 = arith.constant 0 : i32
    return %c0_i32, %c0_i32_0 : i32, i32
  }
  func.func @transform_12(%arg0: i32) -> (i32, i32) {
    %c0_i32 = arith.constant 0 : i32
    %c0_i32_0 = arith.constant 0 : i32
    %c0_i32_1 = arith.constant 0 : i32
    return %c0_i32, %c0_i32_0 : i32, i32
  }
  func.func @transform_13(%arg0: i32) -> (i32, i32) {
    %c0_i32 = arith.constant 0 : i32
    %c0_i32_0 = arith.constant 0 : i32
    %c0_i32_1 = arith.constant 0 : i32
    return %c0_i32, %c0_i32_0 : i32, i32
  }
  func.func @transform_14(%arg0: i32) -> (i32, i32, i32) {
    %c0_i32 = arith.constant 0 : i32
    %c0_i32_0 = arith.constant 0 : i32
    %c0_i32_1 = arith.constant 0 : i32
    %c0_i32_2 = arith.constant 0 : i32
    return %c0_i32, %c0_i32_0, %c0_i32_1 : i32, i32, i32
  }
  func.func @transform_15(%arg0: i32) -> (i32, i32) {
    %c0_i32 = arith.constant 0 : i32
    %c0_i32_0 = arith.constant 0 : i32
    %c0_i32_1 = arith.constant 0 : i32
    return %c0_i32, %c0_i32_0 : i32, i32
  }
  func.func @transform_16(%arg0: i32) -> (i32, i32) {
    %c0_i32 = arith.constant 0 : i32
    %c0_i32_0 = arith.constant 0 : i32
    %c0_i32_1 = arith.constant 0 : i32
    return %c0_i32, %c0_i32_0 : i32, i32
  }
  func.func @transform_17(%arg0: i32) -> (i32, i32) {
    %c0_i32 = arith.constant 0 : i32
    %c0_i32_0 = arith.constant 0 : i32
    %c0_i32_1 = arith.constant 0 : i32
    return %c0_i32, %c0_i32_0 : i32, i32
  }
  func.func @transform_18(%arg0: i32) -> (i32, i32) {
    %c0_i32 = arith.constant 0 : i32
    %c0_i32_0 = arith.constant 0 : i32
    %c0_i32_1 = arith.constant 0 : i32
    return %c0_i32, %c0_i32_0 : i32, i32
  }
  func.func @transform_19(%arg0: i32) -> (i32, i32) {
    %c0_i32 = arith.constant 0 : i32
    %c0_i32_0 = arith.constant 0 : i32
    %c0_i32_1 = arith.constant 0 : i32
    return %c0_i32, %c0_i32_0 : i32, i32
  }
}

</mosaic_0001>

<bundles_post_ra>
// kernel: tpu_custom_call.1
= control target key start
LH: loop header
LB: loop body
LE: loop exit
PB: predicated region body
PF: predicated region fallthrough
CT: control target
= control target key end

     0   :  { %s5163_s0 = inlined_call_operand.hbm [shape: f32[16,32], index: 0, kind: input, shape index: {}]   ;;  %s5164_s1 = inlined_call_operand.vmem [shape: f32[32,32], index: 1, kind: input, shape index: {}]   ;;  %s5165_s2 = inlined_call_operand.hbm [shape: f32[16,16], index: 2, kind: input, shape index: {}]   ;;  %s5166_s3 = inlined_call_operand.hbm [shape: f32[16,32], index: 3, kind: input, shape index: {}]   ;;  %s5167_s4 = inlined_call_operand.vmem [shape: f32[32,96], index: 4, kind: input, shape index: {}]   ;;  %s5168_s5 = inlined_call_operand.hbm [shape: f32[1,96], index: 5, kind: input, shape index: {}]   ;;  %s5169_s6 = inlined_call_operand.vmem [shape: f32[32,32], index: 6, kind: input, shape index: {}]   ;;  %s5170_s7 = inlined_call_operand.hbm [shape: f32[1,32], index: 7, kind: input, shape index: {}]   ;;  %s5171_s8 = inlined_call_operand.hbm [shape: f32[32,32], index: 8, kind: input, shape index: {}]   ;;  %s5172_s9 = inlined_call_operand.hbm [shape: f32[1,32], index: 9, kind: input, shape index: {}]   ;;  %s5173_s10 = inlined_call_operand.vmem [shape: f32[32,64], index: 10, kind: input, shape index: {}]   ;;  %s5174_s11 = inlined_call_operand.hbm [shape: f32[1,64], index: 11, kind: input, shape index: {}]   ;;  %s5175_s12 = inlined_call_operand.hbm [shape: f32[32,32], index: 12, kind: input, shape index: {}]   ;;  %s5176_s13 = inlined_call_operand.hbm [shape: f32[1,32], index: 13, kind: input, shape index: {}]   ;;  %s5177_s14 = inlined_call_operand.hbm [shape: f32[3,2,32], index: 14, kind: input, shape index: {}]   ;;  %s5178_s15 = inlined_call_operand.hbm [shape: f32[32,64], index: 15, kind: input, shape index: {}]   ;;  %s5179_s16 = inlined_call_operand.hbm [shape: f32[1,64], index: 16, kind: input, shape index: {}]   ;;  %s5180_s17 = inlined_call_operand.vmem [shape: f32[64,32], index: 17, kind: input, shape index: {}]   ;;  %s5181_s18 = inlined_call_operand.vmem [shape: f32[1,32], index: 18, kind: input, shape index: {}]   ;;  %s5182_s19 = inlined_call_operand.hbm [shape: f32[16,32], index: 19, kind: output, shape index: {}]  }
   0x1   :  { %5189 = sst [smem:[#allocation32_spill]] %s5163_s0 }
   0x2   :  { %5190 = sst [smem:[#allocation33_spill]] %s5164_s1 }
   0x3   :  { %5191 = sst [smem:[#allocation34_spill]] %s5165_s2 }
   0x4   :  { %5192 = sst [smem:[#allocation35_spill]] %s5166_s3 }
   0x5   :  { %24 = vsyncpa [#allocation3], 0 }
   0x6   :  { %25 = vsyncpa [#allocation6], 0 }
   0x7   :  { %26 = vsyncpa [#allocation9], 0 }
   0x8   :  { %27 = vsyncpa [#allocation12], 0 }
   0x9   :  { %28 = vsyncpa [#allocation15], 0 }
   0xa   :  { %29 = vsyncpa [#allocation18], 0 }
   0xb   :  { %30 = vsyncpa [#allocation21], 0 }
   0xc   :  { %31 = vsyncpa [#allocation4], 0  ;;  %s4445_s0 = smov [#allocation5]   ;;  %s4446_s20 = smov [#allocation8]  }
   0xd   :  { %s51_s30 = sshll.u32 %s4445_s0, 4  ;;  %s78_s21 = sshll.u32 %s4446_s20, 4  ;;  %s52_s30 = int_to_ptr.vmem [resolvable:$true] %s51_s30  ;;  %s4574_s21 = int_to_ptr.vmem [resolvable:$true] %s78_s21 }
   0xe   :  { %s5193_s2 = sld [smem:[#allocation34_spill]] }
  0x14   :  { %s4121_s23 = scalar_lea.hbm %s5193_s2, 256 }
  0x15   :  { %p4122_p0 = scmp.ne.s32.totalorder %s5193_s2, %s4121_s23  ;;  %p4125_p1 = scmp.lt.u32.totalorder %s4121_s23, %s5193_s2 }
  0x17   :  { %p4127_p2 = pnand %p4125_p1, %p4122_p0 }
  0x19   :  { %4130 = shalt.err (!%p4127_p2)
}
  0x1a   :  { %s4131_s27 = scalar_lea.vmem %s52_s30, 256  ;;  %p4136_p4 = scmp.lt.s32.totalorder %s52_s30, %s52_s30 }
  0x1b   :  { %p4132_p3 = scmp.ne.s32.totalorder %s52_s30, %s4131_s27  ;;  %p4137_p5 = scmp.lt.s32.totalorder %s4131_s27, %s4131_s27 }
  0x1d   :  { %p4138_p6 = por %p4137_p5, %p4136_p4 }
  0x1f   :  { %p4139_p7 = pnand %p4138_p6, %p4132_p3 }
  0x21   :  { %4142 = shalt.err (!%p4139_p7)
}
  0x22   :  { %s5187_s28 = smov 128   ;;  %s4448_s29 = smov 8  }
  0x23   :  { %57 = dma.hbm_to_vmem [thread:$0]  %s5193_s2, 256, %s52_s30, [#allocation6], %s5187_s28, %s5187_s28, %s4448_s29  }
  0x24   :  { %s4143_s23 = scalar_lea.hbm %s5168_s5, 16 }
  0x25   :  { %p4144_p8 = scmp.ne.s32.totalorder %s5168_s5, %s4143_s23  ;;  %p4147_p9 = scmp.lt.u32.totalorder %s4143_s23, %s5168_s5 }
  0x27   :  { %p4149_p10 = pnand %p4147_p9, %p4144_p8 }
  0x29   :  { %4152 = shalt.err (!%p4149_p10)
}
  0x2a   :  { %s4153_s27 = scalar_lea.vmem %s4574_s21, 16  ;;  %s4157_s30 = scalar_lea.vmem %s4574_s21, 32 }
  0x2b   :  { %p4154_p11 = scmp.ne.s32.totalorder %s4574_s21, %s4153_s27  ;;  %p4158_p12 = scmp.lt.s32.totalorder %s4574_s21, %s4574_s21 }
  0x2c   :  { %p4159_p13 = scmp.lt.s32.totalorder %s4157_s30, %s4153_s27 }
  0x2e   :  { %p4160_p0 = por %p4159_p13, %p4158_p12 }
  0x30   :  { %p4161_p1 = pnand %p4160_p0, %p4154_p11 }
  0x32   :  { %4164 = shalt.err (!%p4161_p1)
}
  0x33   :  { %81 = dma.hbm_to_vmem [thread:$0]  %s5168_s5, 16, %s4574_s21, [#allocation9]  }
  0x34   :  { %s4449_s20 = smov [#allocation11]   ;;  %s4450_s22 = smov [#allocation14]  }
  0x35   :  { %s99_s1 = sshll.u32 %s4449_s20, 4  ;;  %s124_s23 = sshll.u32 %s4450_s22, 4  ;;  %s100_s1 = int_to_ptr.vmem [resolvable:$true] %s99_s1  ;;  %s125_s23 = int_to_ptr.vmem [resolvable:$true] %s124_s23 }
  0x36   :  { %s4165_s3 = scalar_lea.hbm %s5171_s8, 512 }
  0x37   :  { %p4166_p2 = scmp.ne.s32.totalorder %s5171_s8, %s4165_s3  ;;  %p4169_p3 = scmp.lt.u32.totalorder %s4165_s3, %s5171_s8 }
  0x39   :  { %p4171_p4 = pnand %p4169_p3, %p4166_p2 }
  0x3b   :  { %4174 = shalt.err (!%p4171_p4)
}
  0x3c   :  { %s4175_s5 = scalar_lea.vmem %s100_s1, 512  ;;  %p4180_p6 = scmp.lt.s32.totalorder %s100_s1, %s100_s1 }
  0x3d   :  { %p4176_p5 = scmp.ne.s32.totalorder %s100_s1, %s4175_s5  ;;  %p4181_p7 = scmp.lt.s32.totalorder %s4175_s5, %s4175_s5 }
  0x3f   :  { %p4182_p8 = por %p4181_p7, %p4180_p6 }
  0x41   :  { %p4183_p9 = pnand %p4182_p8, %p4176_p5 }
  0x43   :  { %4186 = shalt.err (!%p4183_p9)
}
  0x44   :  { %s5194_s21 = smov 128   ;;  %s4187_s28 = scalar_lea.hbm %s5174_s11, 16 }
  0x45   :  { %105 = dma.hbm_to_vmem [thread:$0]  %s5171_s8, 512, %s100_s1, [#allocation12], %s5194_s21, %s5194_s21, %s4448_s29  }
  0x46   :  { %p4188_p10 = scmp.ne.s32.totalorder %s5174_s11, %s4187_s28  ;;  %p4191_p11 = scmp.lt.u32.totalorder %s4187_s28, %s5174_s11 }
  0x48   :  { %p4193_p12 = pnand %p4191_p11, %p4188_p10 }
  0x4a   :  { %4196 = shalt.err (!%p4193_p12)
}
  0x4b   :  { %s4197_s27 = scalar_lea.vmem %s125_s23, 16  ;;  %s4201_s30 = scalar_lea.vmem %s125_s23, 32 }
  0x4c   :  { %p4198_p13 = scmp.ne.s32.totalorder %s125_s23, %s4197_s27  ;;  %p4202_p0 = scmp.lt.s32.totalorder %s125_s23, %s125_s23 }
  0x4d   :  { %p4203_p1 = scmp.lt.s32.totalorder %s4201_s30, %s4197_s27 }
  0x4f   :  { %p4204_p2 = por %p4203_p1, %p4202_p0 }
  0x51   :  { %p4205_p3 = pnand %p4204_p2, %p4198_p13 }
  0x53   :  { %4208 = shalt.err (!%p4205_p3)
}
  0x54   :  { %127 = dma.hbm_to_vmem [thread:$0]  %s5174_s11, 16, %s125_s23, [#allocation15]  }
  0x55   :  { %s4451_s5 = smov [#allocation17]   ;;  %s4452_s0 = smov [#allocation20]  }
  0x56   :  { %s146_s2 = sshll.u32 %s4451_s5, 4  ;;  %s167_s20 = sshll.u32 %s4452_s0, 4  ;;  %s147_s2 = int_to_ptr.vmem [resolvable:$true] %s146_s2  ;;  %s4636_s20 = int_to_ptr.vmem [resolvable:$true] %s167_s20 }
  0x57   :  { %s4209_s24 = scalar_lea.hbm %s5176_s13, 16 }
  0x58   :  { %p4210_p4 = scmp.ne.s32.totalorder %s5176_s13, %s4209_s24  ;;  %p4213_p5 = scmp.lt.u32.totalorder %s4209_s24, %s5176_s13 }
  0x5a   :  { %p4215_p6 = pnand %p4213_p5, %p4210_p4 }
  0x5c   :  { %4218 = shalt.err (!%p4215_p6)
}
  0x5d   :  { %s4219_s11 = scalar_lea.vmem %s147_s2, 16  ;;  %s4223_s23 = scalar_lea.vmem %s147_s2, 32 }
  0x5e   :  { %p4220_p7 = scmp.ne.s32.totalorder %s147_s2, %s4219_s11  ;;  %p4224_p8 = scmp.lt.s32.totalorder %s147_s2, %s147_s2 }
  0x5f   :  { %p4225_p9 = scmp.lt.s32.totalorder %s4223_s23, %s4219_s11 }
  0x61   :  { %p4226_p10 = por %p4225_p9, %p4224_p8 }
  0x63   :  { %p4227_p11 = pnand %p4226_p10, %p4220_p7 }
  0x65   :  { %4230 = shalt.err (!%p4227_p11)
}
  0x66   :  { %149 = dma.hbm_to_vmem [thread:$0]  %s5176_s13, 16, %s147_s2, [#allocation18]  }
  0x67   :  { %s4231_s0 = scalar_lea.hbm %s5178_s15, 512 }
  0x68   :  { %p4232_p12 = scmp.ne.s32.totalorder %s5178_s15, %s4231_s0  ;;  %p4235_p13 = scmp.lt.u32.totalorder %s4231_s0, %s5178_s15 }
  0x6a   :  { %p4237_p0 = pnand %p4235_p13, %p4232_p12 }
  0x6c   :  { %4240 = shalt.err (!%p4237_p0)
}
  0x6d   :  { %s4241_s3 = scalar_lea.vmem %s4636_s20, 512  ;;  %p4246_p2 = scmp.lt.s32.totalorder %s4636_s20, %s4636_s20 }
  0x6e   :  { %p4242_p1 = scmp.ne.s32.totalorder %s4636_s20, %s4241_s3  ;;  %p4247_p3 = scmp.lt.s32.totalorder %s4241_s3, %s4241_s3 }
  0x70   :  { %p4248_p4 = por %p4247_p3, %p4246_p2 }
  0x72   :  { %p4249_p5 = pnand %p4248_p4, %p4242_p1 }
  0x74   :  { %4252 = shalt.err (!%p4249_p5)
}
  0x75   :  { %173 = dma.hbm_to_vmem [thread:$0]  %s5178_s15, 512, %s4636_s20, [#allocation21], %s5194_s21, %s5194_s21, %s4448_s29  }
  0x76   :  { %s4453_s26 = smov [#allocation2]   ;;  %s4454_s11 = smov [#allocation7]  }
  0x77   :  { %s37_s27 = sshll.u32 %s4453_s26, 4  ;;  %s63_s23 = sshll.u32 %s4454_s11, 4  ;;  %s38_s27 = int_to_ptr.vmem [resolvable:$true] %s37_s27  ;;  %s4670_s23 = int_to_ptr.vmem [resolvable:$true] %s63_s23 }
  0x78   :  { %s5195_s1 = sld [smem:[#allocation32_spill]] }
  0x7e   :  { %s4253_s5 = scalar_lea.hbm %s5195_s1, 256 }
  0x7f   :  { %p4254_p6 = scmp.ne.s32.totalorder %s5195_s1, %s4253_s5  ;;  %p4257_p7 = scmp.lt.u32.totalorder %s4253_s5, %s5195_s1 }
  0x81   :  { %p4259_p8 = pnand %p4257_p7, %p4254_p6 }
  0x83   :  { %4262 = shalt.err (!%p4259_p8)
}
  0x84   :  { %s4263_s15 = scalar_lea.vmem %s38_s27, 256  ;;  %p4268_p10 = scmp.lt.s32.totalorder %s38_s27, %s38_s27 }
  0x85   :  { %p4264_p9 = scmp.ne.s32.totalorder %s38_s27, %s4263_s15  ;;  %p4269_p11 = scmp.lt.s32.totalorder %s4263_s15, %s4263_s15 }
  0x87   :  { %p4270_p12 = por %p4269_p11, %p4268_p10 }
  0x89   :  { %p4271_p13 = pnand %p4270_p12, %p4264_p9 }
  0x8b   :  { %4274 = shalt.err (!%p4271_p13)
}
  0x8c   :  { %43 = dma.hbm_to_vmem [thread:$0]  %s5195_s1, 256, %s38_s27, [#allocation3], %s5194_s21, %s5194_s21, %s4448_s29  }
  0x8d   :  { %s5196_s2 = sld [smem:[#allocation35_spill]] }
  0x93   :  { %s4275_s26 = scalar_lea.hbm %s5196_s2, 256 }
  0x94   :  { %p4276_p0 = scmp.ne.s32.totalorder %s5196_s2, %s4275_s26  ;;  %p4279_p1 = scmp.lt.u32.totalorder %s4275_s26, %s5196_s2 }
  0x96   :  { %p4281_p2 = pnand %p4279_p1, %p4276_p0 }
  0x98   :  { %4284 = shalt.err (!%p4281_p2)
}
  0x99   :  { %s4285_s0 = scalar_lea.vmem %s4670_s23, 256  ;;  %p4290_p4 = scmp.lt.s32.totalorder %s4670_s23, %s4670_s23 }
  0x9a   :  { %p4286_p3 = scmp.ne.s32.totalorder %s4670_s23, %s4285_s0  ;;  %p4291_p5 = scmp.lt.s32.totalorder %s4285_s0, %s4285_s0 }
  0x9c   :  { %p4292_p6 = por %p4291_p5, %p4290_p4 }
  0x9e   :  { %p4293_p7 = pnand %p4292_p6, %p4286_p3 }
  0xa0   :  { %4296 = shalt.err (!%p4293_p7)
}
  0xa1   :  { %69 = dma.hbm_to_vmem [thread:$0]  %s5196_s2, 256, %s4670_s23, [#allocation6], %s5194_s21, %s5194_s21, %s4448_s29  }
  0xa2   :  { %s4455_s22 = smov [#allocation10]   ;;  %s4456_s24 = smov [#allocation13]  }
  0xa3   :  { %s90_s28 = sshll.u32 %s4455_s22, 4  ;;  %s112_s15 = sshll.u32 %s4456_s24, 4  ;;  %s91_s28 = int_to_ptr.vmem [resolvable:$true] %s90_s28  ;;  %s113_s15 = int_to_ptr.vmem [resolvable:$true] %s112_s15 }
  0xa4   :  { %s4297_s3 = scalar_lea.hbm %s5170_s7, 16 }
  0xa5   :  { %p4298_p8 = scmp.ne.s32.totalorder %s5170_s7, %s4297_s3  ;;  %p4301_p9 = scmp.lt.u32.totalorder %s4297_s3, %s5170_s7 }
  0xa7   :  { %p4303_p10 = pnand %p4301_p9, %p4298_p8 }
  0xa9   :  { %4306 = shalt.err (!%p4303_p10)
}
  0xaa   :  { %s4307_s23 = scalar_lea.vmem %s91_s28, 16  ;;  %s4311_s2 = scalar_lea.vmem %s91_s28, 32 }
  0xab   :  { %p4308_p11 = scmp.ne.s32.totalorder %s91_s28, %s4307_s23  ;;  %p4312_p12 = scmp.lt.s32.totalorder %s91_s28, %s91_s28 }
  0xac   :  { %p4313_p13 = scmp.lt.s32.totalorder %s4311_s2, %s4307_s23 }
  0xae   :  { %p4314_p0 = por %p4313_p13, %p4312_p12 }
  0xb0   :  { %p4315_p1 = pnand %p4314_p0, %p4308_p11 }
  0xb2   :  { %4318 = shalt.err (!%p4315_p1)
}
  0xb3   :  { %93 = dma.hbm_to_vmem [thread:$0]  %s5170_s7, 16, %s91_s28, [#allocation9]  }
  0xb4   :  { %s4319_s1 = scalar_lea.hbm %s5172_s9, 16 }
  0xb5   :  { %p4320_p2 = scmp.ne.s32.totalorder %s5172_s9, %s4319_s1  ;;  %p4323_p3 = scmp.lt.u32.totalorder %s4319_s1, %s5172_s9 }
  0xb7   :  { %p4325_p4 = pnand %p4323_p3, %p4320_p2 }
  0xb9   :  { %4328 = shalt.err (!%p4325_p4)
}
  0xba   :  { %s4329_s3 = scalar_lea.vmem %s113_s15, 16  ;;  %s4333_s13 = scalar_lea.vmem %s113_s15, 32 }
  0xbb   :  { %p4330_p5 = scmp.ne.s32.totalorder %s113_s15, %s4329_s3  ;;  %p4334_p6 = scmp.lt.s32.totalorder %s113_s15, %s113_s15 }
  0xbc   :  { %p4335_p7 = scmp.lt.s32.totalorder %s4333_s13, %s4329_s3 }
  0xbe   :  { %p4336_p8 = por %p4335_p7, %p4334_p6 }
  0xc0   :  { %p4337_p9 = pnand %p4336_p8, %p4330_p5 }
  0xc2   :  { %4340 = shalt.err (!%p4337_p9)
}
  0xc3   :  { %115 = dma.hbm_to_vmem [thread:$0]  %s5172_s9, 16, %s113_s15, [#allocation12]  }
  0xc4   :  { %s4457_s26 = smov [#allocation16]   ;;  %s4458_s30 = smov [#allocation19]  }
  0xc5   :  { %s133_s11 = sshll.u32 %s4457_s26, 4  ;;  %s155_s23 = sshll.u32 %s4458_s30, 4  ;;  %s134_s11 = int_to_ptr.vmem [resolvable:$true] %s133_s11  ;;  %s4731_s23 = int_to_ptr.vmem [resolvable:$true] %s155_s23 }
  0xc6   :  { %s4341_s5 = scalar_lea.hbm %s5175_s12, 512 }
  0xc7   :  { %p4342_p10 = scmp.ne.s32.totalorder %s5175_s12, %s4341_s5  ;;  %p4345_p11 = scmp.lt.u32.totalorder %s4341_s5, %s5175_s12 }
  0xc9   :  { %p4347_p12 = pnand %p4345_p11, %p4342_p10 }
  0xcb   :  { %4350 = shalt.err (!%p4347_p12)
}
  0xcc   :  { %s4351_s9 = scalar_lea.vmem %s134_s11, 512  ;;  %p4356_p0 = scmp.lt.s32.totalorder %s134_s11, %s134_s11 }
  0xcd   :  { %p4352_p13 = scmp.ne.s32.totalorder %s134_s11, %s4351_s9  ;;  %p4357_p1 = scmp.lt.s32.totalorder %s4351_s9, %s4351_s9 }
  0xcf   :  { %p4358_p2 = por %p4357_p1, %p4356_p0 }
  0xd1   :  { %p4359_p3 = pnand %p4358_p2, %p4352_p13 }
  0xd3   :  { %4362 = shalt.err (!%p4359_p3)
}
  0xd4   :  { %139 = dma.hbm_to_vmem [thread:$0]  %s5175_s12, 512, %s134_s11, [#allocation15], %s5194_s21, %s5194_s21, %s4448_s29  }
  0xd5   :  { %s4363_s3 = scalar_lea.hbm %s5177_s14, 96 }
  0xd6   :  { %p4364_p4 = scmp.ne.s32.totalorder %s5177_s14, %s4363_s3  ;;  %p4367_p5 = scmp.lt.u32.totalorder %s4363_s3, %s5177_s14 }
  0xd8   :  { %p4369_p6 = pnand %p4367_p5, %p4364_p4 }
  0xda   :  { %4372 = shalt.err (!%p4369_p6)
}
  0xdb   :  { %s4373_s30 = scalar_lea.vmem %s4731_s23, 96  ;;  %p4378_p8 = scmp.lt.s32.totalorder %s4731_s23, %s4731_s23 }
  0xdc   :  { %p4374_p7 = scmp.ne.s32.totalorder %s4731_s23, %s4373_s30  ;;  %p4379_p9 = scmp.lt.s32.totalorder %s4373_s30, %s4373_s30 }
  0xde   :  { %p4380_p10 = por %p4379_p9, %p4378_p8 }
  0xe0   :  { %p4381_p11 = pnand %p4380_p10, %p4374_p7 }
  0xe2   :  { %4384 = shalt.err (!%p4381_p11)
}
  0xe3   :  { %s4459_s12 = smov 32   ;;  %s4460_s11 = smov 2  }
  0xe4   :  { %161 = dma.hbm_to_vmem [thread:$0]  %s5177_s14, 96, %s4731_s23, [#allocation18], %s4459_s12, %s4459_s12, %s4460_s11  }
  0xe5   :  { %s4461_s5 = smov [#allocation22]   ;;  %s4385_s22 = scalar_lea.hbm %s5179_s16, 16 }
  0xe6   :  { %s180_s0 = sshll.u32 %s4461_s5, 4  ;;  %p4386_p12 = scmp.ne.s32.totalorder %s5179_s16, %s4385_s22  ;;  %s181_s0 = int_to_ptr.vmem [resolvable:$true] %s180_s0 }
  0xe7   :  { %p4389_p13 = scmp.lt.u32.totalorder %s4385_s22, %s5179_s16 }
  0xe9   :  { %p4391_p0 = pnand %p4389_p13, %p4386_p12 }
  0xeb   :  { %4394 = shalt.err (!%p4391_p0)
}
  0xec   :  { %s4395_s25 = scalar_lea.vmem %s181_s0, 16  ;;  %s4399_s14 = scalar_lea.vmem %s181_s0, 32 }
  0xed   :  { %p4396_p1 = scmp.ne.s32.totalorder %s181_s0, %s4395_s25  ;;  %p4400_p2 = scmp.lt.s32.totalorder %s181_s0, %s181_s0 }
  0xee   :  { %p4401_p3 = scmp.lt.s32.totalorder %s4399_s14, %s4395_s25 }
  0xf0   :  { %p4402_p4 = por %p4401_p3, %p4400_p2 }
  0xf2   :  { %p4403_p5 = pnand %p4402_p4, %p4396_p1 }
  0xf4   :  { %4406 = shalt.err (!%p4403_p5)
}
  0xf5   :  { %183 = dma.hbm_to_vmem [thread:$0]  %s5179_s16, 16, %s181_s0, [#allocation21]  }
  0xf6   :  { %4429 = dma.done.wait [#allocation3], 256  }
  0xf7   :  { %4430 = vsyncadd [#allocation3], 4294967040 }
  0xf8   :  { %4431 = dma.done.wait [#allocation6], 512  }
  0xf9   :  { %4432 = vsyncadd [#allocation6], 4294966784 }
  0xfa   :  { %4433 = dma.done.wait [#allocation9], 32  }
  0xfb   :  { %4434 = vsyncadd [#allocation9], 4294967264 }
  0xfc   :  { %4435 = dma.done.wait [#allocation12], 528  }
  0xfd   :  { %4436 = vsyncadd [#allocation12], 4294966768 }
  0xfe   :  { %4437 = dma.done.wait [#allocation15], 528  }
  0xff   :  { %4438 = vsyncadd [#allocation15], 4294966768 }
 0x100   :  { %4439 = dma.done.wait [#allocation18], 112  }
 0x101   :  { %4440 = vsyncadd [#allocation18], 4294967184 }
 0x102   :  { %4441 = dma.done.wait [#allocation21], 528  }
 0x103   :  { %4442 = vsyncadd [#allocation21], 4294966768  ;;  %vm290_vm0 = vcmask 261120   ;;  %v237_v0 = vld [vmem:[%s5167_s4] sm:$0xff]  ;;  %v238_v1 = vld [vmem:[%s5167_s4 + $0x8] sm:$0xff]  ;;  %vm378_vm1 = vcmask 64512  }
 0x104   :  { %v239_v2 = vld [vmem:[%s5167_s4 + $0x10] sm:$0xff]  ;;  %v3726_v3 = vpack.c.bf16 %v238_v1, %v237_v0  ;;  %v240_v4 = vld [vmem:[%s5167_s4 + $0x18] sm:$0xff]  ;;  %v4789_v5 = vld [vmem:[#allocation2] sm:$0xff]  ;;  %s4462_s4 = smov 120   ;;  %s4463_s2 = smov 96   ;;  %vm466_vm3 = vcmask 130048  }
 0x105   :  { %v3730_v6 = vpack.c.bf16 %v240_v4, %v239_v2  ;;  %3484 = vmatprep.mubr.msk.f32.mxu1 %vm290_vm0, %v4789_v5  ;;  %v4793_v7 = vld [vmem:[#allocation2 + $0x8] sm:$0xff]  ;;  %v3239_v8 = vld [vmem:[#allocation8] ss:$0 sm:$0xff]  ;;  %s4464_s8 = smov 88   ;;  %s4465_s5 = smov 112   ;;  %vm4823_vm2 = vmpackc.low %vm378_vm1, %vm378_vm1  ;;  %vm3092_vm4 = vcmask 523264  }
 0x106   :  { %3727 = vmatprep.subr.bf16.mxu1 %v3726_v3  ;;  %s4466_s0 = smov 80   ;;  %v4845_v32 = vld [vmem:[#allocation5 + $0x8] sm:$0xff]  ;;  %v4847_v35 = vld [vmem:[#allocation5] sm:$0xff]  ;;  %s4467_s27 = smov 56  }
 0x107   :  { %3729 = vmatpush3.bf16.msra.mxu1 %v3726_v3  ;;  %s4468_s1 = smov 72   ;;  %s4469_s22 = smov 64  }
 0x108   :  { %3731 = vmatprep.subr.bf16.mxu1 %v3730_v6  ;;  %s4470_s9 = smov 104   ;;  %s4471_s15 = smov 48  }
 0x109   :  { %s4472_s24 = smov 40   ;;  %s5199_s20 = sld [smem:[#allocation33_spill]] }
 0x10b   :  { %3733 = vmatpush3.bf16.msra.mxu1 %v3730_v6 }
 0x10e   :  { %3485 = vmatmul.mubr.msk.f32.vlgmr.msra.gmra.mrb[0].mxu1 %vm290_vm0, %v4793_v7 }
 0x1e1   :  { %v3486_v9 = vpop.f32.mrb[0].mxu1 }
 0x1e2   :  { %v4797_v10 = vadd.f32 %v3486_v9, %v3239_v8  ;;  %v363_v11 = vpop.f32.mrb[1].mxu1 }
 0x1e3   :  { %v4799_v12 = vadd.f32 %v3239_v8, %v363_v11 }
 0x1e5   :  { %576 = vrot.lane.b32.xlu1 %v4799_v12, %s4462_s4  ;;  %3491 = vmatprep.mubr.msk.f32.mxu1 %vm378_vm1, %v4799_v12  ;;  %v4807_v13 = vpack.i.bf16 %v4797_v10, %v4799_v12 }
 0x1e7   :  { %3936 = vrot.lane.b32.xlu0 %v4807_v13, %s4463_s2 }
 0x1e9   :  { %578 = vrot.lane.b32.xlu1 %v4797_v10, %s4462_s4 }
 0x1eb   :  { %3941 = vrot.lane.b32.xlu0 %v4807_v13, %s4464_s8 }
 0x1ed   :  { %942 = vrot.lane.b32.xlu1 %v4799_v12, %s4465_s5 }
 0x1ef   :  { %3946 = vrot.lane.b32.xlu0 %v4807_v13, %s4466_s0 }
 0x1f3   :  { %944 = vrot.lane.b32.xlu0 %v4797_v10, %s4465_s5 }
 0x257   :  { %v577_v24 = vpop.permute.xlu1 %576 }
 0x259   :  { %v3937_v14 = vpop.permute.xlu0 %3936 }
 0x25a   :  { %v3939_v15 = vunpack.i.h.bf16 %v3937_v14  ;;  %v3938_v16 = vunpack.i.l.bf16 %v3937_v14 }
 0x25b   :  { %v579_v28 = vpop.permute.xlu1 %578 }
 0x25c   :  { %v3734_v18 = vpack.c.bf16 %v3939_v15, %v3938_v16 }
 0x25d   :  { %v3942_v19 = vpop.permute.xlu0 %3941 }
 0x25e   :  { %v3944_v20 = vunpack.i.h.bf16 %v3942_v19  ;;  %v3943_v21 = vunpack.i.l.bf16 %v3942_v19  ;;  %3736 = vmatprep.subr.msk.bf16.mxu1 %vm4823_vm2, %v3734_v18 }
 0x25f   :  { %3739 = vmatpush3.bf16.xpose.msk.msra.mxu1 %vm4823_vm2, %v3734_v18  ;;  %v943_v29 = vpop.permute.xlu1 %942 }
 0x260   :  { %v3744_v22 = vpack.c.bf16 %v3944_v20, %v3943_v21 }
 0x261   :  { %v3947_v23 = vpop.permute.xlu0 %3946 }
 0x262   :  { %v3949_v25 = vunpack.i.h.bf16 %v3947_v23  ;;  %v3948_v26 = vunpack.i.l.bf16 %v3947_v23  ;;  %3746 = vmatprep.subr.msk.bf16.mxu1 %vm4823_vm2, %v3744_v22 }
 0x264   :  { %v3754_v27 = vpack.c.bf16 %v3949_v25, %v3948_v26 }
 0x265   :  { %v945_v30 = vpop.permute.xlu0 %944 }
 0x266   :  { %3492 = vmatmul.mubr.msk.f32.vlgmr.msra.gmra.mrb[2].mxu1 %vm378_vm1, %v4797_v10 }
 0x267   :  { %3749 = vmatpush3.bf16.xpose.msk.msra.mxu1 %vm4823_vm2, %v3744_v22  ;;  %3505 = vmatprep.mubr.msk.f32.mxu1 %vm378_vm1, %v577_v24 }
 0x268   :  { %3756 = vmatprep.subr.msk.bf16.mxu1 %vm4823_vm2, %v3754_v27 }
 0x26e   :  { %3506 = vmatmul.mubr.msk.f32.vlgmr.msra.gmra.mrb[4].mxu1 %vm378_vm1, %v579_v28 }
 0x26f   :  { %3759 = vmatpush3.bf16.xpose.msk.msra.mxu1 %vm4823_vm2, %v3754_v27  ;;  %3529 = vmatprep.mubr.msk.f32.mxu1 %vm378_vm1, %v943_v29 }
 0x276   :  { %3530 = vmatmul.mubr.msk.f32.vlgmr.msra.gmra.mrb[6].mxu1 %vm378_vm1, %v945_v30 }
 0x339   :  { %v3493_v31 = vpop.f32.mrb[2].mxu1 }
 0x33a   :  { %v463_v33 = vmul.f32 0.35355338, %v3493_v31  ;;  %v453_v34 = vpop.f32.mrb[3].mxu1 }
 0x33b   :  { %v462_v36 = vmul.f32 0.35355338, %v453_v34 }
 0x33c   :  { %v465_v37 = vadd.f32 %v463_v33, %v4845_v32 }
 0x33d   :  { %v464_v38 = vadd.f32 %v462_v36, %v4847_v35 }
 0x33e   :  { %v470_v39 = vsel %vm466_vm3, %v465_v37, -inf }
 0x33f   :  { %471 = vmax.xlane.f32.xlu0 %v470_v39  ;;  %v467_v40 = vsel %vm466_vm3, %v464_v38, -inf }
 0x340   :  { %468 = vmax.xlane.f32.xlu1 %v467_v40 }
 0x341   :  { %v3507_v41 = vpop.f32.mrb[4].mxu1 }
 0x342   :  { %v668_v42 = vmul.f32 0.35355338, %v3507_v41  ;;  %v658_v43 = vpop.f32.mrb[5].mxu1 }
 0x343   :  { %v667_v44 = vmul.f32 0.35355338, %v658_v43 }
 0x344   :  { %v670_v45 = vadd.f32 %v668_v42, %v4845_v32 }
 0x345   :  { %v669_v46 = vadd.f32 %v667_v44, %v4847_v35 }
 0x346   :  { %v674_v47 = vsel %vm466_vm3, %v670_v45, -inf }
 0x347   :  { %675 = vmax.xlane.f32.xlu1 %v674_v47  ;;  %v671_v48 = vsel %vm466_vm3, %v669_v46, -inf }
 0x348   :  { %672 = vmax.xlane.f32.xlu0 %v671_v48 }
 0x349   :  { %v3531_v49 = vpop.f32.mrb[6].mxu1 }
 0x34a   :  { %v1024_v50 = vpop.f32.mrb[7].mxu1  ;;  %v1034_v11 = vmul.f32 0.35355338, %v3531_v49 }
 0x34b   :  { %v1033_v9 = vmul.f32 0.35355338, %v1024_v50 }
 0x34c   :  { %v1036_v15 = vadd.f32 %v1034_v11, %v4845_v32 }
 0x34d   :  { %v1035_v14 = vadd.f32 %v1033_v9, %v4847_v35 }
 0x34e   :  { %v1040_v18 = vsel %vm466_vm3, %v1036_v15, -inf }
 0x34f   :  { %v1037_v16 = vsel %vm466_vm3, %v1035_v14, -inf }
 0x3cc   :  { %v472_v51 = vpop.xlane.xlu0 %471 }
 0x3cd   :  { %v474_v52 = vsub.f32 %v465_v37, %v472_v51  ;;  %v469_v53 = vpop.xlane.xlu1 %468 }
 0x3ce   :  { %v473_v54 = vsub.f32 %v464_v38, %v469_v53 }
 0x3cf   :  { %v477_v55 = vmul.f32 1.442695, %v474_v52 }
 0x3d0   :  { %v475_v56 = vmul.f32 1.442695, %v473_v54  ;;  %v243_v54 = vld [vmem:[%s5169_s6 + $0x8] sm:$0xff] }
 0x3d1   :  { %4045 = vpow2.f32 %v477_v55  ;;  %v242_v55 = vld [vmem:[%s5169_s6] sm:$0xff] }
 0x3d2   :  { %4047 = vpow2.f32 %v475_v56 }
 0x3d4   :  { %v676_v57 = vpop.xlane.xlu1 %675 }
 0x3d5   :  { %v678_v58 = vsub.f32 %v670_v45, %v676_v57  ;;  %v673_v59 = vpop.xlane.xlu0 %672 }
 0x3d6   :  { %v677_v60 = vsub.f32 %v669_v46, %v673_v59 }
 0x3d7   :  { %v681_v61 = vmul.f32 1.442695, %v678_v58 }
 0x3d8   :  { %v679_v62 = vmul.f32 1.442695, %v677_v60 }
 0x3d9   :  { %4049 = vpow2.f32 %v681_v61 }
 0x3da   :  { %4051 = vpow2.f32 %v679_v62 }
 0x3db   :  { %v4857_v63 = vpop.eup %4045 }
 0x3dc   :  { %v4048_v0 = vpop.eup %4047  ;;  %v482_v1 = vsel %vm466_vm3, %v4857_v63, 0.0 }
 0x3dd   :  { %483 = vadd.xlane.f32.xlu1 %v482_v1  ;;  %v479_v2 = vsel %vm466_vm3, %v4048_v0, 0.0 }
 0x3de   :  { %480 = vadd.xlane.f32.xlu0 %v479_v2 }
 0x3e3   :  { %v4862_v3 = vpop.eup %4049 }
 0x3e4   :  { %v4052_v4 = vpop.eup %4051  ;;  %v686_v6 = vsel %vm466_vm3, %v4862_v3, 0.0 }
 0x3e5   :  { %687 = vadd.xlane.f32.xlu1 %v686_v6  ;;  %v683_v8 = vsel %vm466_vm3, %v4052_v4, 0.0 }
 0x3e6   :  { %684 = vadd.xlane.f32.xlu0 %v683_v8 }
 0x3f6   :  { %3956 = vrot.lane.b32.xlu1 %v4807_v13, %s4467_s27 }
 0x3fa   :  { %3961 = vrot.lane.b32.xlu1 %v4807_v13, %s4468_s1 }
 0x3fc   :  { %3951 = vrot.lane.b32.xlu0 %v4807_v13, %s4469_s22 }
 0x3fe   :  { %1231 = vrot.lane.b32.xlu1 %v4797_v10, %s4470_s9 }
 0x400   :  { %1229 = vrot.lane.b32.xlu0 %v4799_v12, %s4470_s9 }
 0x41f   :  { %1038 = vmax.xlane.f32.xlu0 %v1037_v16 }
 0x422   :  { %1041 = vmax.xlane.f32.xlu1 %v1040_v18 }
 0x433   :  { %3966 = vrot.lane.b32.xlu1 %v4807_v13, %s4471_s15 }
 0x437   :  { %3971 = vrot.lane.b32.xlu1 %v4807_v13, %s4472_s24 }
 0x46a   :  { %v484_v12 = vpop.xlane.xlu1 %483 }
 0x46b   :  { %v481_v10 = vpop.xlane.xlu0 %480 }
 0x46c   :  { %4053 = vrcp.f32 %v481_v10  ;;  %v244_v10 = vld [vmem:[%s5169_s6 + $0x10] sm:$0xff] }
 0x46d   :  { %4055 = vrcp.f32 %v484_v12 }
 0x472   :  { %v688_v19 = vpop.xlane.xlu1 %687 }
 0x473   :  { %v685_v20 = vpop.xlane.xlu0 %684 }
 0x474   :  { %4057 = vrcp.f32 %v685_v20 }
 0x475   :  { %4059 = vrcp.f32 %v688_v19 }
 0x476   :  { %v4054_v21 = vpop.eup %4053  ;;  %v3957_v22 = vpop.permute.xlu1 %3956 }
 0x477   :  { %v3952_v23 = vpop.permute.xlu0 %3951  ;;  %v487_v24 = vmul.f32 %v4054_v21, %v4048_v0  ;;  %v3959_v25 = vunpack.i.h.bf16 %v3957_v22  ;;  %v3958_v26 = vunpack.i.l.bf16 %v3957_v22  ;;  %v4056_v30 = vpop.eup %4055 }
 0x478   :  { %v3954_v27 = vunpack.i.h.bf16 %v3952_v23  ;;  %v3953_v28 = vunpack.i.l.bf16 %v3952_v23  ;;  %v488_v39 = vmul.f32 %v4056_v30, %v4857_v63 }
 0x479   :  { %3498 = vmatprep.mubr.msk.f32.mxu0 %vm466_vm3, %v487_v24  ;;  %v3750_v36 = vpack.c.bf16 %v3959_v25, %v3958_v26 }
 0x47a   :  { %v3962_v29 = vpop.permute.xlu1 %3961  ;;  %v3740_v13 = vpack.c.bf16 %v3954_v27, %v3953_v28 }
 0x47b   :  { %v3964_v31 = vunpack.i.h.bf16 %v3962_v29  ;;  %v3963_v33 = vunpack.i.l.bf16 %v3962_v29  ;;  %v1230_v34 = vpop.permute.xlu0 %1229 }
 0x47c   :  { %3741 = vmatprep.subr.bf16.mxu0 %v3740_v13  ;;  %3548 = vmatprep.mubr.msk.f32.mxu1 %vm378_vm1, %v1230_v34 }
 0x47d   :  { %v3764_v37 = vpack.c.bf16 %v3964_v31, %v3963_v33  ;;  %3743 = vmatpush3.bf16.msra.mxu0 %v3740_v13  ;;  %v245_v33 = vld [vmem:[%s5169_s6 + $0x18] sm:$0xff] }
 0x47e   :  { %v4058_v38 = vpop.eup %4057  ;;  %3751 = vmatprep.subr.bf16.mxu0 %v3750_v36  ;;  %v1232_v43 = vpop.permute.xlu1 %1231 }
 0x47f   :  { %v4060_v40 = vpop.eup %4059  ;;  %3766 = vmatprep.subr.msk.bf16.mxu1 %vm4823_vm2, %v3764_v37  ;;  %v691_v41 = vmul.f32 %v4058_v38, %v4052_v4 }
 0x480   :  { %3499 = vmatmul.mubr.msk.f32.vlgmr.msra.gmra.mrb[0].mxu0 %vm466_vm3, %v488_v39  ;;  %3769 = vmatpush3.bf16.xpose.msk.msra.mxu1 %vm4823_vm2, %v3764_v37  ;;  %v692_v42 = vmul.f32 %v4060_v40, %v4862_v3 }
 0x481   :  { %3753 = vmatpush3.bf16.msra.mxu0 %v3750_v36  ;;  %3512 = vmatprep.mubr.msk.f32.mxu0 %vm466_vm3, %v691_v41 }
 0x482   :  { %3515 = vmatprep.subr.mxu0 %v243_v54 }
 0x484   :  { %3513 = vmatmul.mubr.msk.f32.vlgmr.msra.gmra.mrb[2].mxu0 %vm466_vm3, %v692_v42 }
 0x485   :  { %3516 = vmatpush3.msra.mxu0 %v243_v54 }
 0x486   :  { %3520 = vmatprep.subr.mxu0 %v242_v55 }
 0x487   :  { %3549 = vmatmul.mubr.msk.f32.vlgmr.msra.gmra.mrb[8].mxu1 %vm378_vm1, %v1232_v43  ;;  %v3274_v43 = vld [vmem:[#allocation10] ss:$0 sm:$0xff] }
 0x4ac   :  { %v1039_v44 = vpop.xlane.xlu0 %1038 }
 0x4ad   :  { %v1043_v45 = vsub.f32 %v1035_v14, %v1039_v44 }
 0x4af   :  { %v1045_v46 = vmul.f32 1.442695, %v1043_v45  ;;  %v1042_v47 = vpop.xlane.xlu1 %1041 }
 0x4b0   :  { %v1044_v48 = vsub.f32 %v1036_v15, %v1042_v47 }
 0x4b1   :  { %4061 = vpow2.f32 %v1045_v46 }
 0x4b2   :  { %v1047_v49 = vmul.f32 1.442695, %v1044_v48 }
 0x4b3   :  { %v3967_v57 = vpop.permute.xlu1 %3966 }
 0x4b4   :  { %4063 = vpow2.f32 %v1047_v49  ;;  %v3969_v61 = vunpack.i.h.bf16 %v3967_v57  ;;  %v3968_v62 = vunpack.i.l.bf16 %v3967_v57 }
 0x4b6   :  { %v3760_v1 = vpack.c.bf16 %v3969_v61, %v3968_v62 }
 0x4b7   :  { %v3972_v11 = vpop.permute.xlu1 %3971 }
 0x4b8   :  { %v3974_v12 = vunpack.i.h.bf16 %v3972_v11  ;;  %v3973_v19 = vunpack.i.l.bf16 %v3972_v11 }
 0x4bb   :  { %v4062_v50 = vpop.eup %4061 }
 0x4bc   :  { %v1049_v51 = vsel %vm466_vm3, %v4062_v50, 0.0 }
 0x4bd   :  { %1050 = vadd.xlane.f32.xlu0 %v1049_v51 }
 0x4be   :  { %v4064_v52 = vpop.eup %4063 }
 0x4bf   :  { %v1052_v53 = vsel %vm466_vm3, %v4064_v52, 0.0 }
 0x4c1   :  { %1053 = vadd.xlane.f32.xlu0 %v1052_v53  ;;  %v253_v53 = vld [vmem:[%s5173_s10 + $0x8] sm:$0xff] }
 0x54a   :  { %v1051_v56 = vpop.xlane.xlu0 %1050 }
 0x54b   :  { %4065 = vrcp.f32 %v1051_v56 }
 0x54e   :  { %v1054_v59 = vpop.xlane.xlu0 %1053 }
 0x54f   :  { %4067 = vrcp.f32 %v1054_v59 }
 0x553   :  { %v3500_v58 = vpop.f32.mrb[0].mxu0 }
 0x554   :  { %v567_v60 = vpop.f32.mrb[1].mxu0 }
 0x555   :  { %v4066_v8 = vpop.eup %4065 }
 0x556   :  { %v1057_v18 = vmul.f32 %v4066_v8, %v4062_v50  ;;  %v247_v8 = vld [vmem:[#allocation11] sm:$0xff] }
 0x557   :  { %v3514_v63 = vpop.f32.mrb[2].mxu0 }
 0x558   :  { %v771_v0 = vpop.f32.mrb[3].mxu0 }
 0x559   :  { %3517 = vmatprep.mubr.msk.f32.mxu0 %vm378_vm1, %v771_v0  ;;  %v4068_v16 = vpop.eup %4067  ;;  %v255_v0 = vld [vmem:[%s5173_s10 + $0x18] sm:$0xff] }
 0x55a   :  { %3518 = vmatmul.mubr.msk.f32.vlgmr.msra.gmra.mrb[4].mxu0 %vm378_vm1, %v3514_v63  ;;  %v3550_v2 = vpop.f32.mrb[8].mxu1  ;;  %v254_v63 = vld [vmem:[%s5173_s10 + $0x10] sm:$0xff] }
 0x55b   :  { %3521 = vmatpush3.msra.mxu0 %v242_v55  ;;  %3522 = vmatprep.mubr.msk.f32.mxu0 %vm378_vm1, %v567_v60  ;;  %v1311_v3 = vpop.f32.mrb[9].mxu1  ;;  %v1321_v4 = vmul.f32 0.35355338, %v3550_v2  ;;  %v229_v2 = vld [vmem:[%s5199_s20] sm:$0xff] }
 0x55c   :  { %3761 = vmatprep.subr.bf16.mxu0 %v3760_v1  ;;  %v1320_v6 = vmul.f32 0.35355338, %v1311_v3  ;;  %v230_v3 = vld [vmem:[%s5199_s20 + $0x8] sm:$0xff] }
 0x55d   :  { %v1323_v15 = vadd.f32 %v1321_v4, %v4845_v32  ;;  %v3770_v32 = vpack.c.bf16 %v3974_v12, %v3973_v19  ;;  %v231_v4 = vld [vmem:[%s5199_s20 + $0x10] sm:$0xff] }
 0x55e   :  { %v1322_v9 = vadd.f32 %v1320_v6, %v4847_v35  ;;  %v1058_v35 = vmul.f32 %v4068_v16, %v4064_v52  ;;  %v252_v52 = vld [vmem:[%s5173_s10] sm:$0xff]  ;;  %v232_v6 = vld [vmem:[%s5199_s20 + $0x18] sm:$0xff] }
 0x55f   :  { %v1327_v20 = vsel %vm466_vm3, %v1323_v15, -inf  ;;  %v3782_v54 = vpack.c.bf16 %v253_v53, %v252_v52 }
 0x560   :  { %v1324_v14 = vsel %vm466_vm3, %v1322_v9, -inf }
 0x561   :  { %1325 = vmax.xlane.f32.xlu0 %v1324_v14  ;;  %v249_v14 = vld [vmem:[#allocation11 + $0x10] sm:$0xff] }
 0x562   :  { %3523 = vmatmul.mubr.msk.f32.vlgmr.msra.gmra.mrb[4].mxu0 %vm378_vm1, %v3500_v58 }
 0x563   :  { %3763 = vmatpush3.bf16.msra.mxu0 %v3760_v1  ;;  %3536 = vmatprep.mubr.msk.f32.mxu0 %vm466_vm3, %v1057_v18  ;;  %v3786_v1 = vpack.c.bf16 %v255_v0, %v254_v63 }
 0x564   :  { %3539 = vmatprep.subr.mxu0 %v244_v10 }
 0x565   :  { %1328 = vmax.xlane.f32.xlu0 %v1327_v20 }
 0x566   :  { %3537 = vmatmul.mubr.msk.f32.vlgmr.msra.gmra.mrb[6].mxu0 %vm466_vm3, %v1058_v35 }
 0x567   :  { %3540 = vmatpush3.msra.mxu0 %v244_v10 }
 0x568   :  { %3771 = vmatprep.subr.bf16.mxu0 %v3770_v32 }
 0x5ee   :  { %v1326_v21 = vpop.xlane.xlu0 %1325 }
 0x5ef   :  { %v1330_v22 = vsub.f32 %v1322_v9, %v1326_v21  ;;  %v248_v9 = vld [vmem:[#allocation11 + $0x8] sm:$0xff]  ;;  %v3275_v21 = vld [vmem:[#allocation19] ss:$0 sm:$0xff] }
 0x5f0   :  { %v3774_v11 = vpack.c.bf16 %v248_v9, %v247_v8 }
 0x5f1   :  { %v1332_v23 = vmul.f32 1.442695, %v1330_v22 }
 0x5f2   :  { %v1329_v24 = vpop.xlane.xlu0 %1328  ;;  %3775 = vmatprep.subr.bf16.mxu1 %v3774_v11 }
 0x5f3   :  { %4069 = vpow2.f32 %v1332_v23  ;;  %v1331_v25 = vsub.f32 %v1323_v15, %v1329_v24  ;;  %v250_v15 = vld [vmem:[#allocation11 + $0x18] sm:$0xff]  ;;  %3777 = vmatpush3.bf16.msra.mxu1 %v3774_v11  ;;  %v3276_v23 = vld [vmem:[#allocation19 + $0x1] ss:$0 sm:$0xff] }
 0x5f4   :  { %v3778_v16 = vpack.c.bf16 %v250_v15, %v249_v14 }
 0x5f5   :  { %v1334_v26 = vmul.f32 1.442695, %v1331_v25 }
 0x5f6   :  { %3779 = vmatprep.subr.bf16.mxu1 %v3778_v16 }
 0x5f7   :  { %4071 = vpow2.f32 %v1334_v26  ;;  %3781 = vmatpush3.bf16.msra.mxu1 %v3778_v16 }
 0x5fd   :  { %v4070_v27 = vpop.eup %4069 }
 0x5fe   :  { %v1336_v28 = vsel %vm466_vm3, %v4070_v27, 0.0 }
 0x5ff   :  { %1337 = vadd.xlane.f32.xlu0 %v1336_v28 }
 0x601   :  { %v4072_v29 = vpop.eup %4071 }
 0x602   :  { %v1339_v13 = vsel %vm466_vm3, %v4072_v29, 0.0 }
 0x603   :  { %1340 = vadd.xlane.f32.xlu0 %v1339_v13  ;;  %v3280_v13 = vld [vmem:[#allocation14] ss:$0 sm:$0xff] }
 0x639   :  { %v3538_v30 = vpop.f32.mrb[6].mxu0 }
 0x63a   :  { %v1137_v31 = vpop.f32.mrb[7].mxu0 }
 0x63b   :  { %3541 = vmatprep.mubr.msk.f32.mxu0 %vm378_vm1, %v1137_v31 }
 0x63c   :  { %3542 = vmatmul.mubr.msk.f32.vlgmr.msra.gmra.mrb[4].mxu0 %vm378_vm1, %v3538_v30 }
 0x63d   :  { %3773 = vmatpush3.bf16.msra.mxu0 %v3770_v32 }
 0x63e   :  { %3558 = vmatprep.subr.mxu0 %v245_v33 }
 0x68c   :  { %v1338_v34 = vpop.xlane.xlu0 %1337 }
 0x68d   :  { %4073 = vrcp.f32 %v1338_v34 }
 0x690   :  { %v1341_v36 = vpop.xlane.xlu0 %1340 }
 0x691   :  { %4075 = vrcp.f32 %v1341_v36 }
 0x697   :  { %v4074_v37 = vpop.eup %4073 }
 0x698   :  { %v1344_v38 = vmul.f32 %v4074_v37, %v4070_v27 }
 0x69a   :  { %3555 = vmatprep.mubr.msk.f32.mxu0 %vm466_vm3, %v1344_v38 }
 0x69b   :  { %v4076_v39 = vpop.eup %4075 }
 0x69c   :  { %v1345_v40 = vmul.f32 %v4076_v39, %v4072_v29 }
 0x69e   :  { %3556 = vmatmul.mubr.msk.f32.vlgmr.msra.gmra.mrb[8].mxu0 %vm466_vm3, %v1345_v40 }
 0x69f   :  { %3559 = vmatpush3.msra.mxu0 %v245_v33 }
 0x6a0   :  { %3783 = vmatprep.subr.bf16.mxu0 %v3782_v54 }
 0x771   :  { %v3557_v41 = vpop.f32.mrb[8].mxu0 }
 0x772   :  { %v1424_v42 = vpop.f32.mrb[9].mxu0 }
 0x773   :  { %3560 = vmatprep.mubr.msk.f32.mxu0 %vm378_vm1, %v1424_v42 }
 0x774   :  { %3561 = vmatmul.mubr.msk.f32.vlgmr.msra.gmra.mrb[4].mxu0 %vm378_vm1, %v3557_v41 }
 0x775   :  { %3785 = vmatpush3.bf16.msra.mxu0 %v3782_v54  ;;  %3582 = vmatprep.mubr.msk.f32.mxu0 %vm290_vm0, %v229_v2  ;;  %v4997_v54 = vld [vmem:[#allocation7 + $0x8] sm:$0xff] }
 0x776   :  { %3787 = vmatprep.subr.bf16.mxu0 %v3786_v1 }
 0x779   :  { %3789 = vmatpush3.bf16.msra.mxu0 %v3786_v1 }
 0x77c   :  { %3583 = vmatmul.mubr.msk.f32.vlgmr.msra.gmra.mrb[10].mxu0 %vm290_vm0, %v230_v3 }
 0x77d   :  { %3585 = vmatprep.mubr.msk.f32.mxu0 %vm290_vm0, %v231_v4 }
 0x780   :  { %3586 = vmatmul.mubr.msk.f32.gmra.mrb[12].mxu0 %vm290_vm0, %v232_v6 }
 0x847   :  { %v3562_v44 = vpop.f32.mrb[4].mxu0 }
 0x848   :  { %v1523_v45 = vadd.f32 %v3562_v44, %v3274_v43  ;;  %v1505_v46 = vpop.f32.mrb[5].mxu0  ;;  %v3277_v44 = vld [vmem:[#allocation13] ss:$0 sm:$0xff] }
 0x849   :  { %v1522_v47 = vadd.f32 %v3274_v43, %v1505_v46 }
 0x84a   :  { %v1525_v48 = vadd.f32 %v1523_v45, %v4793_v7 }
 0x84b   :  { %v1524_v49 = vadd.f32 %v1522_v47, %v4789_v5 }
 0x84c   :  { %v1529_v50 = vsel %vm290_vm0, %v1525_v48, 0.0 }
 0x84d   :  { %1530 = vadd.xlane.f32.xlu1 %v1529_v50  ;;  %v1526_v51 = vsel %vm290_vm0, %v1524_v49, 0.0 }
 0x84e   :  { %1527 = vadd.xlane.f32.xlu0 %v1526_v51  ;;  %v4995_v51 = vld [vmem:[#allocation7] sm:$0xff] }
 0x84f   :  { %v3584_v30 = vpop.f32.mrb[10].mxu0 }
 0x850   :  { %v1742_v31 = vadd.f32 %v3584_v30, %v3280_v13  ;;  %v1736_v33 = vpop.f32.mrb[11].mxu0 }
 0x851   :  { %v1737_v34 = vadd.f32 %v3280_v13, %v1736_v33 }
 0x853   :  { %v3790_v36 = vpack.c.bf16 %v1742_v31, %v1737_v34  ;;  %v4967_v37 = vpack.i.bf16 %v1742_v31, %v1737_v34  ;;  %v3587_v38 = vpop.f32.mrb[12].mxu0 }
 0x854   :  { %v1752_v39 = vadd.f32 %v3587_v38, %v3280_v13  ;;  %v1746_v40 = vpop.f32.mrb[13].mxu0 }
 0x855   :  { %3792 = vmatprep.subr.msk.bf16.mxu1 %vm4823_vm2, %v3790_v36  ;;  %v1747_v41 = vadd.f32 %v3280_v13, %v1746_v40 }
 0x857   :  { %v3796_v42 = vpack.c.bf16 %v1752_v39, %v1747_v41  ;;  %v4973_v43 = vpack.i.bf16 %v1752_v39, %v1747_v41 }
 0x85e   :  { %3981 = vrot.lane.b32.xlu1 %v4973_v43, %s4463_s2 }
 0x8da   :  { %v1531_v7 = vpop.xlane.xlu1 %1530 }
 0x8db   :  { %v1534_v55 = vmul.f32 0.03125, %v1531_v7  ;;  %v1528_v5 = vpop.xlane.xlu0 %1527 }
 0x8dc   :  { %v1533_v56 = vmul.f32 0.03125, %v1528_v5 }
 0x8dd   :  { %v1536_v57 = vsub.f32 %v1525_v48, %v1534_v55 }
 0x8de   :  { %v1535_v58 = vsub.f32 %v1524_v49, %v1533_v56 }
 0x8df   :  { %v1538_v61 = vmul.f32 %v1536_v57, %v1536_v57 }
 0x8e0   :  { %v1537_v59 = vmul.f32 %v1535_v58, %v1535_v58 }
 0x8e1   :  { %v1542_v62 = vsel %vm290_vm0, %v1538_v61, 0.0 }
 0x8e2   :  { %v1539_v60 = vsel %vm290_vm0, %v1537_v59, 0.0 }
 0x8e3   :  { %1540 = vadd.xlane.f32.xlu0 %v1539_v60  ;;  %v3982_v60 = vpop.permute.xlu1 %3981 }
 0x8e4   :  { %v3984_v0 = vunpack.i.h.bf16 %v3982_v60  ;;  %v3983_v2 = vunpack.i.l.bf16 %v3982_v60 }
 0x8e6   :  { %v3806_v8 = vpack.c.bf16 %v3984_v0, %v3983_v2 }
 0x8e7   :  { %1543 = vadd.xlane.f32.xlu0 %v1542_v62 }
 0x970   :  { %v1541_v18 = vpop.xlane.xlu0 %1540 }
 0x971   :  { %v1545_v10 = vmul.f32 0.03125, %v1541_v18 }
 0x973   :  { %v1547_v12 = vadd.f32 1e-05, %v1545_v10 }
 0x974   :  { %v1544_v19 = vpop.xlane.xlu0 %1543 }
 0x975   :  { %4077 = vrsqrt.f32 %v1547_v12  ;;  %v1546_v35 = vmul.f32 0.03125, %v1544_v19 }
 0x977   :  { %v1548_v20 = vadd.f32 1e-05, %v1546_v35 }
 0x979   :  { %4079 = vrsqrt.f32 %v1548_v20 }
 0x97f   :  { %v4078_v32 = vpop.eup %4077 }
 0x980   :  { %v1551_v22 = vmul.f32 %v4078_v32, %v1535_v58 }
 0x982   :  { %v1557_v24 = vmul.f32 %v3275_v21, %v1551_v22 }
 0x983   :  { %v4080_v25 = vpop.eup %4079 }
 0x984   :  { %v1552_v26 = vmul.f32 %v4080_v25, %v1536_v57  ;;  %v4959_v27 = vadd.f32 %v3276_v23, %v1557_v24 }
 0x986   :  { %v1558_v28 = vmul.f32 %v3275_v21, %v1552_v26  ;;  %3571 = vmatprep.mubr.msk.f32.mxu1 %vm290_vm0, %v4959_v27 }
 0x988   :  { %v4963_v29 = vadd.f32 %v3276_v23, %v1558_v28 }
 0x98a   :  { %3572 = vmatmul.mubr.msk.f32.vlgmr.msra.gmra.mrb[10].mxu1 %vm290_vm0, %v4963_v29 }
 0x98b   :  { %3795 = vmatpush3.bf16.xpose.msk.msra.mxu1 %vm4823_vm2, %v3790_v36 }
 0x98c   :  { %3798 = vmatprep.subr.msk.bf16.mxu1 %vm4823_vm2, %v3796_v42 }
 0x993   :  { %3801 = vmatpush3.bf16.xpose.msk.msra.mxu1 %vm4823_vm2, %v3796_v42 }
 0xa5d   :  { %v3573_v45 = vpop.f32.mrb[10].mxu1 }
 0xa5e   :  { %v1643_v46 = vpop.f32.mrb[11].mxu1  ;;  %v4983_v48 = vadd.f32 %v3573_v45, %v3277_v44 }
 0xa5f   :  { %v4981_v47 = vadd.f32 %v3277_v44, %v1643_v46 }
 0xa61   :  { %1967 = vrot.lane.b32.xlu1 %v4981_v47, %s4462_s4  ;;  %3596 = vmatprep.mubr.msk.f32.mxu1 %vm378_vm1, %v4981_v47 }
 0xa62   :  { %3597 = vmatmul.mubr.msk.f32.vlgmr.msra.gmra.mrb[12].mxu1 %vm378_vm1, %v4983_v48 }
 0xa65   :  { %3996 = vrot.lane.b32.xlu1 %v4967_v37, %s4465_s5 }
 0xa69   :  { %2347 = vrot.lane.b32.xlu1 %v4981_v47, %s4465_s5 }
 0xad3   :  { %v1968_v21 = vpop.permute.xlu1 %1967 }
 0xad7   :  { %v3997_v13 = vpop.permute.xlu1 %3996 }
 0xad8   :  { %v3999_v31 = vunpack.i.h.bf16 %v3997_v13  ;;  %v3998_v33 = vunpack.i.l.bf16 %v3997_v13 }
 0xada   :  { %v3830_v34 = vpack.c.bf16 %v3999_v31, %v3998_v33 }
 0xadb   :  { %v2348_v40 = vpop.permute.xlu1 %2347 }
 0xb35   :  { %v3598_v49 = vpop.f32.mrb[12].mxu1 }
 0xb36   :  { %v1839_v50 = vpop.f32.mrb[13].mxu1  ;;  %v1849_v52 = vmul.f32 0.35355338, %v3598_v49 }
 0xb37   :  { %v1848_v53 = vmul.f32 0.35355338, %v1839_v50 }
 0xb38   :  { %v1851_v5 = vadd.f32 %v1849_v52, %v4997_v54 }
 0xb39   :  { %v1850_v7 = vadd.f32 %v1848_v53, %v4995_v51 }
 0xb3a   :  { %v1855_v56 = vsel %vm290_vm0, %v1851_v5, -inf }
 0xb3b   :  { %v1852_v55 = vsel %vm290_vm0, %v1850_v7, -inf }
 0xb3c   :  { %1853 = vmax.xlane.f32.xlu0 %v1852_v55 }
 0xb40   :  { %1856 = vmax.xlane.f32.xlu0 %v1855_v56 }
 0xb56   :  { %3976 = vrot.lane.b32.xlu0 %v4967_v37, %s4463_s2 }
 0xbc9   :  { %v1854_v57 = vpop.xlane.xlu0 %1853 }
 0xbca   :  { %v1858_v58 = vsub.f32 %v1850_v7, %v1854_v57 }
 0xbcc   :  { %v1860_v62 = vmul.f32 1.442695, %v1858_v58 }
 0xbcd   :  { %v1857_v59 = vpop.xlane.xlu0 %1856 }
 0xbce   :  { %v1859_v61 = vsub.f32 %v1851_v5, %v1857_v59 }
 0xbd0   :  { %v1862_v63 = vmul.f32 1.442695, %v1859_v61 }
 0xbd1   :  { %v3977_v1 = vpop.permute.xlu0 %3976 }
 0xbd2   :  { %4081 = vpow2.f32 %v1862_v63  ;;  %v3979_v3 = vunpack.i.h.bf16 %v3977_v1  ;;  %v3978_v4 = vunpack.i.l.bf16 %v3977_v1 }
 0xbd3   :  { %4083 = vpow2.f32 %v1860_v62 }
 0xbd4   :  { %v3802_v6 = vpack.c.bf16 %v3979_v3, %v3978_v4 }
 0xbd6   :  { %3803 = vmatprep.subr.bf16.mxu0 %v3802_v6 }
 0xbd7   :  { %3805 = vmatpush3.bf16.msra.mxu0 %v3802_v6 }
 0xbd8   :  { %3807 = vmatprep.subr.bf16.mxu0 %v3806_v8 }
 0xbdb   :  { %3809 = vmatpush3.bf16.msra.mxu0 %v3806_v8 }
 0xbdc   :  { %v4082_v9 = vpop.eup %4081 }
 0xbdd   :  { %v1867_v11 = vsel %vm290_vm0, %v4082_v9, 0.0  ;;  %v4084_v14 = vpop.eup %4083 }
 0xbde   :  { %1868 = vadd.xlane.f32.xlu0 %v1867_v11  ;;  %v1864_v15 = vsel %vm290_vm0, %v4084_v14, 0.0 }
 0xbe2   :  { %1865 = vadd.xlane.f32.xlu0 %v1864_v15 }
 0xbf8   :  { %3986 = vrot.lane.b32.xlu0 %v4967_v37, %s4462_s4 }
 0xbfc   :  { %3991 = vrot.lane.b32.xlu0 %v4973_v43, %s4462_s4 }
 0xc00   :  { %1969 = vrot.lane.b32.xlu0 %v4983_v48, %s4462_s4 }
 0xc04   :  { %4001 = vrot.lane.b32.xlu0 %v4973_v43, %s4465_s5 }
 0xc08   :  { %2349 = vrot.lane.b32.xlu0 %v4983_v48, %s4465_s5 }
 0xc6b   :  { %v1869_v16 = vpop.xlane.xlu0 %1868 }
 0xc6c   :  { %4085 = vrcp.f32 %v1869_v16 }
 0xc6f   :  { %v1866_v18 = vpop.xlane.xlu0 %1865 }
 0xc70   :  { %4087 = vrcp.f32 %v1866_v18 }
 0xc73   :  { %v3987_v10 = vpop.permute.xlu0 %3986 }
 0xc74   :  { %v3989_v12 = vunpack.i.h.bf16 %v3987_v10  ;;  %v3988_v19 = vunpack.i.l.bf16 %v3987_v10 }
 0xc76   :  { %v3810_v35 = vpack.c.bf16 %v3989_v12, %v3988_v19  ;;  %v4086_v32 = vpop.eup %4085 }
 0xc77   :  { %v3992_v20 = vpop.permute.xlu0 %3991  ;;  %v1873_v26 = vmul.f32 %v4086_v32, %v4082_v9 }
 0xc78   :  { %3812 = vmatprep.subr.msk.bf16.mxu0 %vm4823_vm2, %v3810_v35  ;;  %v3994_v23 = vunpack.i.h.bf16 %v3992_v20  ;;  %v3993_v24 = vunpack.i.l.bf16 %v3992_v20 }
 0xc7a   :  { %v4088_v22 = vpop.eup %4087  ;;  %v3816_v28 = vpack.c.bf16 %v3994_v23, %v3993_v24 }
 0xc7b   :  { %v1872_v25 = vmul.f32 %v4088_v22, %v4084_v14  ;;  %v1970_v30 = vpop.permute.xlu0 %1969 }
 0xc7d   :  { %3607 = vmatprep.mubr.msk.f32.mxu0 %vm290_vm0, %v1872_v25 }
 0xc7e   :  { %3608 = vmatmul.mubr.msk.f32.vlgmr.msra.gmra.mrb[14].mxu0 %vm290_vm0, %v1873_v26 }
 0xc7f   :  { %3815 = vmatpush3.bf16.xpose.msk.msra.mxu0 %vm4823_vm2, %v3810_v35  ;;  %3618 = vmatprep.mubr.msk.f32.mxu0 %vm378_vm1, %v1968_v21  ;;  %v4002_v36 = vpop.permute.xlu0 %4001 }
 0xc80   :  { %3818 = vmatprep.subr.msk.bf16.mxu0 %vm4823_vm2, %v3816_v28  ;;  %v4004_v38 = vunpack.i.h.bf16 %v4002_v36  ;;  %v4003_v39 = vunpack.i.l.bf16 %v4002_v36 }
 0xc82   :  { %v3836_v41 = vpack.c.bf16 %v4004_v38, %v4003_v39 }
 0xc83   :  { %v2350_v42 = vpop.permute.xlu0 %2349 }
 0xc87   :  { %3821 = vmatpush3.bf16.xpose.msk.msra.mxu0 %vm4823_vm2, %v3816_v28 }
 0xc88   :  { %3832 = vmatprep.subr.msk.bf16.mxu0 %vm4823_vm2, %v3830_v34 }
 0xc8e   :  { %3619 = vmatmul.mubr.msk.f32.vlgmr.msra.gmra.mrb[16].mxu0 %vm378_vm1, %v1970_v30 }
 0xc8f   :  { %3835 = vmatpush3.bf16.xpose.msk.msra.mxu0 %vm4823_vm2, %v3830_v34  ;;  %3650 = vmatprep.mubr.msk.f32.mxu0 %vm378_vm1, %v2348_v40  ;;  %v258_v40 = vld [vmem:[#allocation16 + $0x8] sm:$0xff] }
 0xc90   :  { %3838 = vmatprep.subr.msk.bf16.mxu0 %vm4823_vm2, %v3836_v41 }
 0xc97   :  { %3841 = vmatpush3.bf16.xpose.msk.msra.mxu0 %vm4823_vm2, %v3836_v41  ;;  %v257_v41 = vld [vmem:[#allocation16] sm:$0xff] }
 0xc9e   :  { %3651 = vmatmul.mubr.msk.f32.vlgmr.msra.gmra.mrb[18].mxu0 %vm378_vm1, %v2350_v42 }
 0xd51   :  { %v5039_v44 = vpop.f32.mrb[14].mxu0 }
 0xd52   :  { %v5041_v45 = vpop.f32.mrb[15].mxu0 }
 0xd61   :  { %v3620_v46 = vpop.f32.mrb[16].mxu0 }
 0xd62   :  { %v2067_v49 = vmul.f32 0.35355338, %v3620_v46  ;;  %v2057_v50 = vpop.f32.mrb[17].mxu0 }
 0xd63   :  { %v2066_v52 = vmul.f32 0.35355338, %v2057_v50 }
 0xd64   :  { %v2069_v53 = vadd.f32 %v2067_v49, %v4997_v54 }
 0xd65   :  { %v2068_v7 = vadd.f32 %v2066_v52, %v4995_v51 }
 0xd66   :  { %v2073_v55 = vsel %vm290_vm0, %v2069_v53, -inf }
 0xd67   :  { %2074 = vmax.xlane.f32.xlu0 %v2073_v55  ;;  %v2070_v5 = vsel %vm290_vm0, %v2068_v7, -inf }
 0xd68   :  { %2071 = vmax.xlane.f32.xlu1 %v2070_v5 }
 0xd71   :  { %v3652_v56 = vpop.f32.mrb[18].mxu0 }
 0xd72   :  { %v2437_v57 = vpop.f32.mrb[19].mxu0  ;;  %v2447_v6 = vmul.f32 0.35355338, %v3652_v56 }
 0xd73   :  { %v2446_v4 = vmul.f32 0.35355338, %v2437_v57 }
 0xd74   :  { %v2449_v9 = vadd.f32 %v2447_v6, %v4997_v54 }
 0xd75   :  { %v2448_v8 = vadd.f32 %v2446_v4, %v4995_v51 }
 0xd76   :  { %v2453_v14 = vsel %vm290_vm0, %v2449_v9, -inf }
 0xd77   :  { %v2450_v11 = vsel %vm290_vm0, %v2448_v8, -inf }
 0xdf4   :  { %v2075_v58 = vpop.xlane.xlu0 %2074 }
 0xdf5   :  { %v2077_v59 = vsub.f32 %v2069_v53, %v2075_v58  ;;  %v2072_v60 = vpop.xlane.xlu1 %2071 }
 0xdf6   :  { %v2076_v61 = vsub.f32 %v2068_v7, %v2072_v60 }
 0xdf7   :  { %v2080_v62 = vmul.f32 1.442695, %v2077_v59 }
 0xdf8   :  { %v2078_v63 = vmul.f32 1.442695, %v2076_v61  ;;  %v259_v61 = vld [vmem:[#allocation16 + $0x10] sm:$0xff] }
 0xdf9   :  { %4089 = vpow2.f32 %v2080_v62 }
 0xdfa   :  { %4091 = vpow2.f32 %v2078_v63 }
 0xe03   :  { %v4090_v0 = vpop.eup %4089 }
 0xe04   :  { %v4092_v1 = vpop.eup %4091  ;;  %v2085_v2 = vsel %vm290_vm0, %v4090_v0, 0.0 }
 0xe05   :  { %2086 = vadd.xlane.f32.xlu1 %v2085_v2  ;;  %v2082_v3 = vsel %vm290_vm0, %v4092_v1, 0.0 }
 0xe06   :  { %2083 = vadd.xlane.f32.xlu0 %v2082_v3 }
 0xe16   :  { %4011 = vrot.lane.b32.xlu1 %v4973_v43, %s4464_s8 }
 0xe1c   :  { %4006 = vrot.lane.b32.xlu0 %v4967_v37, %s4464_s8 }
 0xe3a   :  { %2451 = vmax.xlane.f32.xlu1 %v2450_v11 }
 0xe3b   :  { %2454 = vmax.xlane.f32.xlu0 %v2453_v14 }
 0xe92   :  { %v2087_v15 = vpop.xlane.xlu1 %2086 }
 0xe93   :  { %v2084_v16 = vpop.xlane.xlu0 %2083 }
 0xe94   :  { %4093 = vrcp.f32 %v2084_v16 }
 0xe95   :  { %4095 = vrcp.f32 %v2087_v15 }
 0xe96   :  { %v4012_v18 = vpop.permute.xlu1 %4011 }
 0xe97   :  { %v4007_v10 = vpop.permute.xlu0 %4006  ;;  %v4014_v12 = vunpack.i.h.bf16 %v4012_v18  ;;  %v4013_v19 = vunpack.i.l.bf16 %v4012_v18 }
 0xe98   :  { %v4009_v35 = vunpack.i.h.bf16 %v4007_v10  ;;  %v4008_v20 = vunpack.i.l.bf16 %v4007_v10 }
 0xe99   :  { %v3826_v21 = vpack.c.bf16 %v4014_v12, %v4013_v19 }
 0xe9a   :  { %v3822_v32 = vpack.c.bf16 %v4009_v35, %v4008_v20 }
 0xe9c   :  { %3823 = vmatprep.subr.bf16.mxu1 %v3822_v32 }
 0xe9d   :  { %3825 = vmatpush3.bf16.msra.mxu1 %v3822_v32 }
 0xe9e   :  { %v4094_v22 = vpop.eup %4093  ;;  %3827 = vmatprep.subr.bf16.mxu1 %v3826_v21 }
 0xe9f   :  { %v4096_v23 = vpop.eup %4095  ;;  %v2090_v24 = vmul.f32 %v4094_v22, %v4092_v1 }
 0xea0   :  { %v2091_v25 = vmul.f32 %v4096_v23, %v4090_v0 }
 0xea1   :  { %3829 = vmatpush3.bf16.msra.mxu1 %v3826_v21  ;;  %3629 = vmatprep.mubr.msk.f32.mxu1 %vm290_vm0, %v2090_v24 }
 0xea2   :  { %3632 = vmatprep.subr.mxu1 %v258_v40 }
 0xea4   :  { %3630 = vmatmul.mubr.msk.f32.vlgmr.msra.gmra.mrb[14].mxu1 %vm290_vm0, %v2091_v25  ;;  %v260_v25 = vld [vmem:[#allocation16 + $0x18] sm:$0xff] }
 0xea5   :  { %3633 = vmatpush3.msra.mxu1 %v258_v40 }
 0xea6   :  { %3637 = vmatprep.subr.mxu1 %v257_v41 }
 0xec7   :  { %v2452_v26 = vpop.xlane.xlu1 %2451 }
 0xec8   :  { %v2456_v28 = vsub.f32 %v2448_v8, %v2452_v26  ;;  %v2455_v13 = vpop.xlane.xlu0 %2454 }
 0xec9   :  { %v2457_v30 = vsub.f32 %v2449_v9, %v2455_v13 }
 0xeca   :  { %v2458_v31 = vmul.f32 1.442695, %v2456_v28 }
 0xecb   :  { %v2460_v33 = vmul.f32 1.442695, %v2457_v30 }
 0xecc   :  { %4097 = vpow2.f32 %v2458_v31 }
 0xecd   :  { %4099 = vpow2.f32 %v2460_v33 }
 0xed6   :  { %v4098_v34 = vpop.eup %4097 }
 0xed7   :  { %v4100_v36 = vpop.eup %4099  ;;  %v2462_v38 = vsel %vm290_vm0, %v4098_v34, 0.0 }
 0xed8   :  { %2463 = vadd.xlane.f32.xlu0 %v2462_v38  ;;  %v2465_v39 = vsel %vm290_vm0, %v4100_v36, 0.0 }
 0xed9   :  { %2466 = vadd.xlane.f32.xlu1 %v2465_v39 }
 0xeea   :  { %4021 = vrot.lane.b32.xlu1 %v4973_v43, %s4466_s0 }
 0xeee   :  { %4026 = vrot.lane.b32.xlu1 %v4967_v37, %s4470_s9  ;;  %4016 = vrot.lane.b32.xlu0 %v4967_v37, %s4466_s0 }
 0xef2   :  { %2648 = vrot.lane.b32.xlu1 %v4981_v47, %s4470_s9  ;;  %4031 = vrot.lane.b32.xlu0 %v4973_v43, %s4470_s9 }
 0xef6   :  { %2650 = vrot.lane.b32.xlu0 %v4983_v48, %s4470_s9 }
 0xf65   :  { %v2464_v42 = vpop.xlane.xlu0 %2463 }
 0xf66   :  { %4101 = vrcp.f32 %v2464_v42  ;;  %v2467_v49 = vpop.xlane.xlu1 %2466 }
 0xf67   :  { %4103 = vrcp.f32 %v2467_v49  ;;  %v3325_v49 = vld [vmem:[#allocation17] ss:$0 sm:$0xff] }
 0xf69   :  { %v4017_v46 = vpop.permute.xlu0 %4016 }
 0xf6a   :  { %v4019_v50 = vunpack.i.h.bf16 %v4017_v46  ;;  %v4018_v52 = vunpack.i.l.bf16 %v4017_v46  ;;  %v4022_v55 = vpop.permute.xlu1 %4021 }
 0xf6b   :  { %v4024_v5 = vunpack.i.h.bf16 %v4022_v55  ;;  %v4023_v56 = vunpack.i.l.bf16 %v4022_v55 }
 0xf6c   :  { %v3842_v47 = vpack.c.bf16 %v4019_v50, %v4018_v52 }
 0xf6d   :  { %v3846_v58 = vpack.c.bf16 %v4024_v5, %v4023_v56 }
 0xf6e   :  { %v4027_v59 = vpop.permute.xlu1 %4026 }
 0xf6f   :  { %v4029_v62 = vunpack.i.h.bf16 %v4027_v59  ;;  %v4028_v63 = vunpack.i.l.bf16 %v4027_v59 }
 0xf70   :  { %v4102_v48 = vpop.eup %4101 }
 0xf71   :  { %v2470_v57 = vmul.f32 %v4102_v48, %v4098_v34  ;;  %v4104_v60 = vpop.eup %4103  ;;  %v3850_v0 = vpack.c.bf16 %v4029_v62, %v4028_v63 }
 0xf72   :  { %v2649_v8 = vpop.permute.xlu1 %2648 }
 0xf77   :  { %v3631_v53 = vpop.f32.mrb[14].mxu1 }
 0xf78   :  { %v2176_v7 = vpop.f32.mrb[15].mxu1 }
 0xf79   :  { %3634 = vmatprep.mubr.msk.f32.mxu1 %vm378_vm1, %v2176_v7 }
 0xf7a   :  { %3635 = vmatmul.mubr.msk.f32.vlgmr.msra.gmra.mrb[16].mxu1 %vm378_vm1, %v3631_v53 }
 0xf7b   :  { %3638 = vmatpush3.msra.mxu1 %v257_v41  ;;  %3639 = vmatprep.mubr.msk.f32.mxu1 %vm378_vm1, %v5041_v45  ;;  %v2471_v45 = vmul.f32 %v4104_v60, %v4100_v36 }
 0xf7c   :  { %3843 = vmatprep.subr.bf16.mxu1 %v3842_v47 }
 0xf82   :  { %3640 = vmatmul.mubr.msk.f32.vlgmr.msra.gmra.mrb[16].mxu1 %vm378_vm1, %v5039_v44  ;;  %v4032_v44 = vpop.permute.xlu0 %4031 }
 0xf83   :  { %3845 = vmatpush3.bf16.msra.mxu1 %v3842_v47  ;;  %3661 = vmatprep.mubr.msk.f32.mxu1 %vm290_vm0, %v2470_v57  ;;  %v4034_v1 = vunpack.i.h.bf16 %v4032_v44  ;;  %v4033_v2 = vunpack.i.l.bf16 %v4032_v44 }
 0xf84   :  { %3847 = vmatprep.subr.bf16.mxu1 %v3846_v58 }
 0xf85   :  { %v3856_v6 = vpack.c.bf16 %v4034_v1, %v4033_v2  ;;  %v272_v1 = vld [vmem:[#allocation20 + $0x10] sm:$0xff]  ;;  %v273_v2 = vld [vmem:[#allocation20 + $0x18] sm:$0xff] }
 0xf86   :  { %v2651_v9 = vpop.permute.xlu0 %2650 }
 0xf87   :  { %3849 = vmatpush3.bf16.msra.mxu1 %v3846_v58 }
 0xf88   :  { %3664 = vmatprep.subr.mxu1 %v259_v61 }
 0xf8a   :  { %3662 = vmatmul.mubr.msk.f32.vlgmr.msra.gmra.mrb[18].mxu1 %vm290_vm0, %v2471_v45 }
 0xf8b   :  { %3665 = vmatpush3.msra.mxu1 %v259_v61 }
 0xf8c   :  { %3852 = vmatprep.subr.msk.bf16.mxu1 %vm4823_vm2, %v3850_v0 }
0x105d   :  { %v3663_v3 = vpop.f32.mrb[18].mxu1 }
0x105e   :  { %v2556_v4 = vpop.f32.mrb[19].mxu1 }
0x105f   :  { %3666 = vmatprep.mubr.msk.f32.mxu1 %vm378_vm1, %v2556_v4  ;;  %v275_v4 = vld [vmem:[%s5180_s17] sm:$0xff] }
0x1060   :  { %3667 = vmatmul.mubr.msk.f32.vlgmr.msra.gmra.mrb[16].mxu1 %vm378_vm1, %v3663_v3  ;;  %v3874_v3 = vpack.c.bf16 %v273_v2, %v272_v1  ;;  %v3334_v1 = vld [vmem:[#allocation19 + $0x4] ss:$0 sm:$0xff] }
0x1061   :  { %3855 = vmatpush3.bf16.xpose.msk.msra.mxu1 %vm4823_vm2, %v3850_v0  ;;  %3677 = vmatprep.mubr.msk.f32.mxu1 %vm378_vm1, %v2649_v8  ;;  %v271_v0 = vld [vmem:[#allocation20 + $0x8] sm:$0xff] }
0x1062   :  { %3858 = vmatprep.subr.msk.bf16.mxu1 %vm4823_vm2, %v3856_v6 }
0x1069   :  { %3861 = vmatpush3.bf16.xpose.msk.msra.mxu1 %vm4823_vm2, %v3856_v6  ;;  %v276_v6 = vld [vmem:[%s5180_s17 + $0x8] sm:$0xff] }
0x106a   :  { %3691 = vmatprep.subr.mxu1 %v260_v25  ;;  %v3878_v8 = vpack.c.bf16 %v276_v6, %v275_v4  ;;  %v3335_v6 = vld [vmem:[#allocation19 + $0x5] ss:$0 sm:$0xff] }
0x1070   :  { %3678 = vmatmul.mubr.msk.f32.vlgmr.msra.gmra.mrb[20].mxu1 %vm378_vm1, %v2651_v9 }
0x1071   :  { %3692 = vmatpush3.msra.mxu1 %v260_v25  ;;  %v279_v25 = vld [vmem:[%s5180_s17 + $0x20] sm:$0xff] }
0x1143   :  { %v3679_v11 = vpop.f32.mrb[20].mxu1 }
0x1144   :  { %v2748_v14 = vmul.f32 0.35355338, %v3679_v11  ;;  %v2738_v15 = vpop.f32.mrb[21].mxu1 }
0x1145   :  { %v2747_v16 = vmul.f32 0.35355338, %v2738_v15 }
0x1146   :  { %v2750_v18 = vadd.f32 %v2748_v14, %v4997_v54 }
0x1147   :  { %v2749_v10 = vadd.f32 %v2747_v16, %v4995_v51 }
0x1148   :  { %v2754_v12 = vsel %vm290_vm0, %v2750_v18, -inf }
0x1149   :  { %2755 = vmax.xlane.f32.xlu0 %v2754_v12  ;;  %v2751_v19 = vsel %vm290_vm0, %v2749_v10, -inf  ;;  %v3326_v12 = vld [vmem:[#allocation19 + $0x2] ss:$0 sm:$0xff] }
0x114a   :  { %2752 = vmax.xlane.f32.xlu1 %v2751_v19 }
0x11d6   :  { %v2756_v35 = vpop.xlane.xlu0 %2755 }
0x11d7   :  { %v2758_v17 = vsub.f32 %v2750_v18, %v2756_v35  ;;  %v2753_v20 = vpop.xlane.xlu1 %2752 }
0x11d8   :  { %v2757_v32 = vsub.f32 %v2749_v10, %v2753_v20  ;;  %v3327_v20 = vld [vmem:[#allocation19 + $0x3] ss:$0 sm:$0xff] }
0x11d9   :  { %v2761_v21 = vmul.f32 1.442695, %v2758_v17 }
0x11da   :  { %v2759_v22 = vmul.f32 1.442695, %v2757_v32 }
0x11db   :  { %4105 = vpow2.f32 %v2761_v21 }
0x11dc   :  { %4107 = vpow2.f32 %v2759_v22  ;;  %v277_v22 = vld [vmem:[%s5180_s17 + $0x10] sm:$0xff] }
0x11e5   :  { %v4106_v23 = vpop.eup %4105 }
0x11e6   :  { %v4108_v24 = vpop.eup %4107  ;;  %v2766_v54 = vsel %vm290_vm0, %v4106_v23, 0.0 }
0x11e7   :  { %2767 = vadd.xlane.f32.xlu1 %v2766_v54  ;;  %v2763_v51 = vsel %vm290_vm0, %v4108_v24, 0.0 }
0x11e8   :  { %2764 = vadd.xlane.f32.xlu0 %v2763_v51 }
0x11f8   :  { %4041 = vrot.lane.b32.xlu1 %v4973_v43, %s4468_s1 }
0x11fe   :  { %4036 = vrot.lane.b32.xlu0 %v4967_v37, %s4468_s1 }
0x1274   :  { %v2768_v26 = vpop.xlane.xlu1 %2767 }
0x1275   :  { %v2765_v28 = vpop.xlane.xlu0 %2764 }
0x1276   :  { %4109 = vrcp.f32 %v2765_v28 }
0x1277   :  { %4111 = vrcp.f32 %v2768_v26  ;;  %v280_v26 = vld [vmem:[%s5180_s17 + $0x28] sm:$0xff] }
0x1278   :  { %v4042_v13 = vpop.permute.xlu1 %4041  ;;  %v3886_v28 = vpack.c.bf16 %v280_v26, %v279_v25 }
0x1279   :  { %v4037_v30 = vpop.permute.xlu0 %4036  ;;  %v4044_v31 = vunpack.i.h.bf16 %v4042_v13  ;;  %v4043_v33 = vunpack.i.l.bf16 %v4042_v13  ;;  %v281_v13 = vld [vmem:[%s5180_s17 + $0x30] sm:$0xff] }
0x127a   :  { %v4039_v34 = vunpack.i.h.bf16 %v4037_v30  ;;  %v4038_v36 = vunpack.i.l.bf16 %v4037_v30  ;;  %v282_v30 = vld [vmem:[%s5180_s17 + $0x38] sm:$0xff] }
0x127b   :  { %v3866_v39 = vpack.c.bf16 %v4044_v31, %v4043_v33  ;;  %v3890_v31 = vpack.c.bf16 %v282_v30, %v281_v13  ;;  %v3328_v33 = vld [vmem:[#allocation22] ss:$0 sm:$0xff] }
0x127c   :  { %v3862_v38 = vpack.c.bf16 %v4039_v34, %v4038_v36 }
0x127e   :  { %3863 = vmatprep.subr.bf16.mxu0 %v3862_v38 }
0x127f   :  { %3865 = vmatpush3.bf16.msra.mxu0 %v3862_v38 }
0x1280   :  { %v4110_v43 = vpop.eup %4109  ;;  %3867 = vmatprep.subr.bf16.mxu0 %v3866_v39 }
0x1281   :  { %v4112_v37 = vpop.eup %4111  ;;  %v2771_v40 = vmul.f32 %v4110_v43, %v4108_v24 }
0x1282   :  { %v2772_v41 = vmul.f32 %v4112_v37, %v4106_v23  ;;  %v278_v23 = vld [vmem:[%s5180_s17 + $0x18] sm:$0xff]  ;;  %s4473_s17 = smov [#allocation23]  }
0x1283   :  { %3869 = vmatpush3.bf16.msra.mxu0 %v3866_v39  ;;  %3688 = vmatprep.mubr.msk.f32.mxu0 %vm290_vm0, %v2771_v40  ;;  %v3882_v51 = vpack.c.bf16 %v278_v23, %v277_v22  ;;  %v3331_v40 = vld [vmem:[%s5181_s18] ss:$0 sm:$0xff]  ;;  %s3221_s18 = sshll.u32 %s4473_s17, 4  ;;  %s3222_s18 = int_to_ptr.vmem [resolvable:$true] %s3221_s18 }
0x1284   :  { %s4407_s24 = scalar_lea.vmem %s3222_s18, 256  ;;  %p4412_p7 = scmp.lt.s32.totalorder %s3222_s18, %s3222_s18 }
0x1285   :  { %p4408_p6 = scmp.ne.s32.totalorder %s3222_s18, %s4407_s24  ;;  %p4413_p8 = scmp.lt.s32.totalorder %s4407_s24, %s4407_s24 }
0x1286   :  { %3689 = vmatmul.mubr.msk.f32.vlgmr.msra.gmra.mrb[20].mxu0 %vm290_vm0, %v2772_v41 }
0x1287   :  { %p4414_p9 = por %p4413_p8, %p4412_p7 }
0x1289   :  { %p4415_p10 = pnand %p4414_p9, %p4408_p6 }
0x1359   :  { %v3690_v42 = vpop.f32.mrb[20].mxu0 }
0x135a   :  { %v2857_v46 = vpop.f32.mrb[21].mxu0 }
0x135b   :  { %3693 = vmatprep.mubr.msk.f32.mxu1 %vm378_vm1, %v2857_v46 }
0x135c   :  { %3694 = vmatmul.mubr.msk.f32.vlgmr.msra.gmra.mrb[16].mxu1 %vm378_vm1, %v3690_v42 }
0x142f   :  { %v3695_v50 = vpop.f32.mrb[16].mxu1 }
0x1430   :  { %v2956_v52 = vadd.f32 %v3695_v50, %v3325_v49  ;;  %v2938_v53 = vpop.f32.mrb[17].mxu1 }
0x1431   :  { %v2955_v7 = vadd.f32 %v3325_v49, %v2938_v53 }
0x1432   :  { %v2958_v47 = vadd.f32 %v2956_v52, %v4963_v29 }
0x1433   :  { %v2957_v55 = vadd.f32 %v2955_v7, %v4959_v27  ;;  %v270_v27 = vld [vmem:[#allocation20] sm:$0xff] }
0x1434   :  { %v2962_v48 = vsel %vm290_vm0, %v2958_v47, 0.0  ;;  %v3870_v44 = vpack.c.bf16 %v271_v0, %v270_v27 }
0x1435   :  { %2963 = vadd.xlane.f32.xlu0 %v2962_v48  ;;  %v2959_v5 = vsel %vm290_vm0, %v2957_v55, 0.0 }
0x1436   :  { %2960 = vadd.xlane.f32.xlu1 %v2959_v5  ;;  %3871 = vmatprep.subr.bf16.mxu0 %v3870_v44 }
0x1437   :  { %3873 = vmatpush3.bf16.msra.mxu0 %v3870_v44 }
0x1438   :  { %3875 = vmatprep.subr.bf16.mxu0 %v3874_v3 }
0x143b   :  { %3877 = vmatpush3.bf16.msra.mxu0 %v3874_v3 }
0x143c   :  { %3879 = vmatprep.subr.bf16.mxu0 %v3878_v8 }
0x14c2   :  { %v2964_v56 = vpop.xlane.xlu0 %2963 }
0x14c3   :  { %v2966_v57 = vmul.f32 0.03125, %v2964_v56  ;;  %v2961_v58 = vpop.xlane.xlu1 %2960 }
0x14c4   :  { %v2965_v59 = vmul.f32 0.03125, %v2961_v58 }
0x14c5   :  { %v2968_v60 = vsub.f32 %v2958_v47, %v2966_v57 }
0x14c6   :  { %v2967_v61 = vsub.f32 %v2957_v55, %v2965_v59 }
0x14c7   :  { %v2970_v62 = vmul.f32 %v2968_v60, %v2968_v60 }
0x14c8   :  { %v2969_v63 = vmul.f32 %v2967_v61, %v2967_v61 }
0x14c9   :  { %v2974_v45 = vsel %vm290_vm0, %v2970_v62, 0.0 }
0x14ca   :  { %2975 = vadd.xlane.f32.xlu1 %v2974_v45  ;;  %v2971_v29 = vsel %vm290_vm0, %v2969_v63, 0.0 }
0x14cb   :  { %2972 = vadd.xlane.f32.xlu0 %v2971_v29 }
0x1557   :  { %v2976_v9 = vpop.xlane.xlu1 %2975 }
0x1558   :  { %v2978_v11 = vmul.f32 0.03125, %v2976_v9  ;;  %v2973_v14 = vpop.xlane.xlu0 %2972 }
0x1559   :  { %v2977_v15 = vmul.f32 0.03125, %v2973_v14 }
0x155a   :  { %v2980_v16 = vadd.f32 1e-05, %v2978_v11 }
0x155b   :  { %v2979_v18 = vadd.f32 1e-05, %v2977_v15 }
0x155c   :  { %4113 = vrsqrt.f32 %v2980_v16 }
0x155d   :  { %4115 = vrsqrt.f32 %v2979_v18 }
0x1566   :  { %v4114_v10 = vpop.eup %4113 }
0x1567   :  { %v4116_v19 = vpop.eup %4115  ;;  %v2984_v35 = vmul.f32 %v4114_v10, %v2968_v60 }
0x1568   :  { %v2983_v17 = vmul.f32 %v4116_v19, %v2967_v61 }
0x1569   :  { %v2990_v32 = vmul.f32 %v3326_v12, %v2984_v35 }
0x156a   :  { %v2989_v21 = vmul.f32 %v3326_v12, %v2983_v17 }
0x156b   :  { %v2996_v54 = vadd.f32 %v3327_v20, %v2990_v32 }
0x156c   :  { %v2995_v24 = vadd.f32 %v3327_v20, %v2989_v21 }
0x156e   :  { %3704 = vmatprep.mubr.msk.f32.mxu0 %vm290_vm0, %v2995_v24 }
0x156f   :  { %3705 = vmatmul.mubr.msk.f32.vlgmr.msra.gmra.mrb[22].mxu0 %vm290_vm0, %v2996_v54 }
0x1570   :  { %3881 = vmatpush3.bf16.msra.mxu0 %v3878_v8 }
0x1571   :  { %3883 = vmatprep.subr.bf16.mxu0 %v3882_v51 }
0x1574   :  { %3885 = vmatpush3.bf16.msra.mxu0 %v3882_v51 }
0x1575   :  { %3887 = vmatprep.subr.bf16.mxu0 %v3886_v28 }
0x1578   :  { %3889 = vmatpush3.bf16.msra.mxu0 %v3886_v28 }
0x1579   :  { %3891 = vmatprep.subr.bf16.mxu0 %v3890_v31 }
0x157c   :  { %3893 = vmatpush3.bf16.msra.mxu0 %v3890_v31 }
0x1642   :  { %v3706_v34 = vpop.f32.mrb[22].mxu0 }
0x1643   :  { %v3081_v36 = vadd.f32 %v3706_v34, %v3328_v33  ;;  %v3075_v38 = vpop.f32.mrb[23].mxu0 }
0x1644   :  { %v3076_v39 = vadd.f32 %v3328_v33, %v3075_v38 }
0x1645   :  { %v3085_v37 = vmax.f32 %v3081_v36, 0.0 }
0x1646   :  { %v3084_v43 = vmax.f32 %v3076_v39, 0.0 }
0x1648   :  { %3723 = vmatprep.mubr.msk.f32.mxu0 %vm3092_vm4, %v3084_v43 }
0x1649   :  { %3724 = vmatmul.mubr.msk.f32.vlgmr.msra.gmra.mrb[24].mxu0 %vm3092_vm4, %v3085_v37 }
0x171c   :  { %v3725_v41 = vpop.f32.mrb[24].mxu0 }
0x171d   :  { %v3171_v42 = vadd.f32 %v3725_v41, %v3331_v40  ;;  %v3165_v46 = vpop.f32.mrb[25].mxu0 }
0x171e   :  { %v3166_v49 = vadd.f32 %v3331_v40, %v3165_v46 }
0x171f   :  { %v3175_v50 = vadd.f32 %v3171_v42, %v2996_v54 }
0x1720   :  { %v3174_v52 = vadd.f32 %v3166_v49, %v2995_v24 }
0x1721   :  { %v3179_v53 = vsel %vm290_vm0, %v3175_v50, 0.0 }
0x1722   :  { %3180 = vadd.xlane.f32.xlu1 %v3179_v53  ;;  %v3176_v7 = vsel %vm290_vm0, %v3174_v52, 0.0 }
0x1723   :  { %3177 = vadd.xlane.f32.xlu0 %v3176_v7 }
0x17af   :  { %v3181_v47 = vpop.xlane.xlu1 %3180 }
0x17b0   :  { %v3183_v55 = vmul.f32 0.03125, %v3181_v47  ;;  %v3178_v48 = vpop.xlane.xlu0 %3177 }
0x17b1   :  { %v3182_v5 = vmul.f32 0.03125, %v3178_v48 }
0x17b2   :  { %v3185_v56 = vsub.f32 %v3175_v50, %v3183_v55 }
0x17b3   :  { %v3184_v57 = vsub.f32 %v3174_v52, %v3182_v5 }
0x17b4   :  { %v3187_v58 = vmul.f32 %v3185_v56, %v3185_v56 }
0x17b5   :  { %v3186_v59 = vmul.f32 %v3184_v57, %v3184_v57 }
0x17b6   :  { %v3191_v60 = vsel %vm290_vm0, %v3187_v58, 0.0 }
0x17b7   :  { %3192 = vadd.xlane.f32.xlu1 %v3191_v60  ;;  %v3188_v61 = vsel %vm290_vm0, %v3186_v59, 0.0 }
0x17b8   :  { %3189 = vadd.xlane.f32.xlu0 %v3188_v61 }
0x1844   :  { %v3193_v62 = vpop.xlane.xlu1 %3192 }
0x1845   :  { %v3195_v63 = vmul.f32 0.03125, %v3193_v62  ;;  %v3190_v45 = vpop.xlane.xlu0 %3189 }
0x1846   :  { %v3194_v29 = vmul.f32 0.03125, %v3190_v45 }
0x1847   :  { %v3197_v27 = vadd.f32 1e-05, %v3195_v63 }
0x1848   :  { %v3196_v0 = vadd.f32 1e-05, %v3194_v29 }
0x1849   :  { %4117 = vrsqrt.f32 %v3197_v27 }
0x184a   :  { %4119 = vrsqrt.f32 %v3196_v0 }
0x1853   :  { %v4118_v44 = vpop.eup %4117 }
0x1854   :  { %v4120_v2 = vpop.eup %4119  ;;  %v3201_v3 = vmul.f32 %v4118_v44, %v3185_v56 }
0x1855   :  { %v3200_v4 = vmul.f32 %v4120_v2, %v3184_v57 }
0x1856   :  { %v3207_v8 = vmul.f32 %v3334_v1, %v3201_v3 }
0x1857   :  { %v3206_v9 = vmul.f32 %v3334_v1, %v3200_v4 }
0x1858   :  { %v3213_v11 = vadd.f32 %v3335_v6, %v3207_v8 }
0x1859   :  { %v3212_v14 = vadd.f32 %v3335_v6, %v3206_v9 }
0x185a   :  { %3215 = vst.msk [vmem:[#allocation23 + $0x8] sm:$0xff] %vm290_vm0, %v3213_v11 }
0x185b   :  { %3214 = vst.msk [vmem:[#allocation23] sm:$0xff] %vm290_vm0, %v3212_v14 }
0x185c   :  { %4418 = shalt.err (!%p4415_p10)
}
0x185d   :  { %s4419_s14 = scalar_lea.hbm %s5182_s19, 256 }
0x185e   :  { %p4420_p11 = scmp.ne.s32.totalorder %s5182_s19, %s4419_s14  ;;  %p4423_p12 = scmp.lt.u32.totalorder %s4419_s14, %s5182_s19 }
0x1860   :  { %p4425_p13 = pnand %p4423_p12, %p4420_p11 }
0x1862   :  { %4428 = shalt.err (!%p4425_p13)
}
0x1863   :  { %3227 = dma.vmem_to_hbm [thread:$0]  %s3222_s18, 256, %s5182_s19, [#allocation4], %s5194_s21, %s5194_s21, %s4448_s29  }
0x1864   :  { %4443 = dma.done.wait [#allocation4], 256  }
0x1865   :  { %4444 = vsyncadd [#allocation4], 4294967040 }
0x1866   :  { %3231 = vsyncpa [#allocation3], 1 }
0x1867   :  { %3232 = vsyncpa [#allocation6], 1 }
0x1868   :  { %3233 = vsyncpa [#allocation9], 1 }
0x1869   :  { %3234 = vsyncpa [#allocation12], 1 }
0x186a   :  { %3235 = vsyncpa [#allocation15], 1 }
0x186b   :  { %3236 = vsyncpa [#allocation18], 1 }
0x186c   :  { %3237 = vsyncpa [#allocation21], 1 }
0x186d   :  { %3238 = vsyncpa [#allocation4], 1 }

</bundles_post_ra>
